<compile_context>
chip_gen: v5e
topology: v5e:2x2
jax: 0.10.0
libtpu: 0.0.40
codegen_flags: <defaults>
</compile_context>

<pallas_src>
import jax
import jax.numpy as jnp
from jax.experimental import pallas as pl
from jax.experimental.pallas import tpu as pltpu


def _vmem_capacity_bytes():
    """Physical VMEM of the current chip; conservative 64 MiB fallback."""
    try:
        info = pltpu.get_tpu_info()
        cap = getattr(info, "vmem_capacity_bytes", None)
        if cap:
            return int(cap)
    except Exception:
        pass
    return 64 * 1024 * 1024


def _choose_tile_h(N, H, W, cin, co, budget, fused_k):
    """Largest H-tile dividing H whose working set fits `budget`, preferring
    enough grid steps for megacore pipelining once M=tile_h*W is big enough to
    amortize the ~0.35us per-step overhead."""
    in_bytes = 2 * (H + 2) * (W + 2) * cin * 4            # resident image, 2 bufs
    const_bytes = 2 * (9 * cin * co + 2 * co) * 4          # weights + bias + alpha

    def working_set(t):
        out_b = 2 * t * W * co * 4                         # output block, 2 bufs
        acc_b = t * W * co * 4                             # f32 accumulator
        lhs_b = t * W * (9 * cin if fused_k else cin) * 4  # im2col / tap slice
        return in_bytes + const_bytes + out_b + acc_b + lhs_b

    cands = [t for t in range(H, 0, -1) if H % t == 0]
    fitting = [t for t in cands if working_set(t) <= budget]
    if not fitting:
        # TODO(synk): for images whose padded NHWC plane alone exceeds the VMEM
        # budget, add a W tile axis / halo-streamed H blocks instead of keeping
        # the full image resident.
        return 1
    for t in fitting:                      # descending
        if N * (H // t) >= 8 and t * W >= 512:
            return t
    for t in fitting:
        if N * (H // t) >= 4 and t * W >= 128:
            return t
    return fitting[0]


def subpixel_block(x_nchw, w_oihw, bias, alpha, scale_factor):
    """Conv2d(3x3, pad=1) -> PixelShuffle(r) -> PReLU(alpha per out-channel).

    x_nchw: (N, Cin, H, W) f32
    w_oihw: (Cout*r^2, Cin, 3, 3) f32
    bias:   (Cout*r^2,) f32
    alpha:  (Cout,) f32
    returns (N, Cout, H*r, W*r) f32 (NCHW, like PyTorch).
    """
    r = int(scale_factor)
    N, Cin, H, W = x_nchw.shape
    Co = w_oihw.shape[0]
    Cout = Co // (r * r)
    assert Co == Cout * r * r

    fused_k = (9 * Cin) >= 256            # fill the MXU K dim only when worth it

    cap = _vmem_capacity_bytes()
    budget = int(0.45 * cap)              # working-set target (per the review)
    vmem_limit = int(0.70 * cap)          # ~45 MiB on v7x, ~90 MiB on v5e/v6e
    tile_h = _choose_tile_h(N, H, W, Cin, Co, budget, fused_k)
    n_h = H // tile_h

    # ---- host-side operand prep (one-shot XLA ops, contiguous operands) -----
    # NCHW -> NHWC + 1-pixel zero halo for the "same" 3x3 conv.
    x_pad = jnp.pad(jnp.transpose(x_nchw, (0, 2, 3, 1)),
                    ((0, 0), (1, 1), (1, 1), (0, 0)))

    # Reorder conv-output channels (c, i, j) -> (i, j, c) so the PixelShuffle
    # becomes a plain reshape of the lane axis after the kernel.
    w_p = (w_oihw.reshape(Cout, r, r, Cin, 3, 3)
           .transpose(1, 2, 0, 3, 4, 5).reshape(Co, Cin, 3, 3))
    w_taps = jnp.transpose(w_p, (2, 3, 1, 0))              # (3, 3, Cin, Co)
    w_arg = (w_taps.reshape(9 * Cin, Co) if fused_k
             else w_taps.reshape(9, Cin, Co))
    b_p = bias.reshape(Cout, r, r).transpose(1, 2, 0).reshape(1, Co)
    a_p = jnp.tile(alpha, r * r).reshape(1, Co)            # alpha[c] @ (i*r+j)*Cout+c

    def kernel(x_ref, w_ref, b_ref, a_ref, o_ref):
        row0 = pl.program_id(1) * tile_h    # top row of this tile in padded img

        if fused_k:
            # im2col (lane-axis concat of 9 tap windows) + single fused-K dot.
            cols = [x_ref[0, pl.ds(row0 + dy, tile_h), pl.ds(dx, W), :]
                    for dy in range(3) for dx in range(3)]
            lhs = jnp.concatenate(cols, axis=-1).reshape(tile_h * W, 9 * Cin)
            acc = jnp.dot(lhs, w_ref[...], preferred_element_type=jnp.float32)
        else:
            # 9 accumulating dots: no lane-axis concat, no 9x lhs temp.
            acc = None
            for dy in range(3):
                for dx in range(3):
                    patch = x_ref[0, pl.ds(row0 + dy, tile_h), pl.ds(dx, W), :]
                    d = jnp.dot(patch.reshape(tile_h * W, Cin),
                                w_ref[dy * 3 + dx],
                                preferred_element_type=jnp.float32)
                    acc = d if acc is None else acc + d

        acc = acc + b_ref[...]                                # bias
        acc = jnp.where(acc >= 0.0, acc, a_ref[...] * acc)    # PReLU
        # Single unmasked, lane-dense (Co-wide) store of the whole tile.
        o_ref[0] = acc.reshape(tile_h, W, Co).astype(o_ref.dtype)

    in_specs = [
        # Full padded image of one batch element; index map is constant along
        # the h axis, so the block is DMA'd once per image and stays resident.
        pl.BlockSpec((1, H + 2, W + 2, Cin), lambda n, h: (n, 0, 0, 0)),
        (pl.BlockSpec((9 * Cin, Co), lambda n, h: (0, 0)) if fused_k
         else pl.BlockSpec((9, Cin, Co), lambda n, h: (0, 0, 0))),
        pl.BlockSpec((1, Co), lambda n, h: (0, 0)),
        pl.BlockSpec((1, Co), lambda n, h: (0, 0)),
    ]

    out = pl.pallas_call(
        kernel,
        out_shape=jax.ShapeDtypeStruct((N, H, W, Co), jnp.float32),
        grid=(N, n_h),
        in_specs=in_specs,
        out_specs=pl.BlockSpec((1, tile_h, W, Co), lambda n, h: (n, h, 0, 0)),
        compiler_params=pltpu.CompilerParams(
            dimension_semantics=("parallel", "parallel"),
            vmem_limit_bytes=vmem_limit),
    )(x_pad, w_arg, b_p, a_p)

    # Pixel-shuffle + NCHW conversion in one host transpose (needed anyway for
    # PyTorch layout parity; consumers that accept NHWC could skip it).
    y = out.reshape(N, H, W, r, r, Cout)            # lanes ordered (i, j, c)
    y = jnp.transpose(y, (0, 5, 1, 3, 2, 4))        # (N, Cout, H, r, W, r)
    return y.reshape(N, Cout, H * r, W * r)


subpixel_block_jit = jax.jit(subpixel_block, static_argnums=(4,))


def _reference(x_nchw, w_oihw, bias, alpha, r):
    """Pure-JAX reference matching PyTorch semantics (NCHW)."""
    N, Cin, H, W = x_nchw.shape
    Co = w_oihw.shape[0]
    Cout = Co // (r * r)
    conv = jax.lax.conv_general_dilated(
        x_nchw, w_oihw, window_strides=(1, 1), padding="SAME",
        dimension_numbers=("NCHW", "OIHW", "NCHW"),
    ) + bias.reshape(1, Co, 1, 1)
    y = conv.reshape(N, Cout, r, r, H, W)
    y = jnp.transpose(y, (0, 1, 4, 2, 5, 3)).reshape(N, Cout, H * r, W * r)
    a = alpha.reshape(1, Cout, 1, 1)
    return jnp.where(y >= 0, y, a * y)


if __name__ == "__main__":
    def run_case(n, cin, cout, scale, h, w):
        co = cout * scale * scale
        key = jax.random.PRNGKey(0)
        kx, kw, kb = jax.random.split(key, 3)
        x = jax.random.normal(kx, (n, cin, h, w), dtype=jnp.float32)
        wgt = jax.random.normal(kw, (co, cin, 3, 3), dtype=jnp.float32) * 0.05
        b = jax.random.normal(kb, (co,), dtype=jnp.float32) * 0.05
        alpha = jnp.full((cout,), 0.25, dtype=jnp.float32)

        out = jax.block_until_ready(subpixel_block_jit(x, wgt, b, alpha, scale))
        ref = jax.block_until_ready(_reference(x, wgt, b, alpha, scale))
        assert out.shape == (n, cout, h * scale, w * scale), out.shape
        err = float(jnp.max(jnp.abs(out - ref)))
        assert jnp.allclose(out, ref, atol=1e-4, rtol=1e-4), err

    # Main case: Cout=64, scale=2 -> Co=256 lanes (fully dense stores),
    # small-Cin 9-dot path.
    run_case(n=2, cin=16, cout=64, scale=2, h=16, w=16)
    # Tiny channel counts (masked-lane path, Co=32) still correct.
    run_case(n=1, cin=8, cout=8, scale=2, h=16, w=16)
    # Module-default channels (Cin=64) exercise the fused-K im2col path.
    run_case(n=1, cin=64, cout=64, scale=2, h=8, w=8)

    print("KERNEL_OK")
</pallas_src>

<mosaic_0001>
module attributes {stable_mosaic.version = 11 : i64} {
  func.func @kernel(%arg0: i32, %arg1: i32, %arg2: memref<1x18x18x16xf32, #tpu.memory_space<vmem>>, %arg3: memref<9x16x256xf32, #tpu.memory_space<vmem>>, %arg4: memref<1x256xf32, #tpu.memory_space<vmem>>, %arg5: memref<1x256xf32, #tpu.memory_space<vmem>>, %arg6: memref<1x8x16x256xf32, #tpu.memory_space<vmem>>) attributes {dimension_semantics = [#tpu.dimension_semantics<parallel>, #tpu.dimension_semantics<parallel>], iteration_bounds = array<i64: 2, 2>, scalar_prefetch = 0 : i64, scratch_operands = 0 : i64, tpu.core_type = #tpu.core_type<tc>, window_params = [{transform_indices = @transform_0, window_bounds = array<i64: 1, 18, 18, 16>}, {pipeline_mode = #tpu.pipeline_mode<synchronous>, transform_indices = @transform_1, window_bounds = array<i64: 9, 16, 256>}, {pipeline_mode = #tpu.pipeline_mode<synchronous>, transform_indices = @transform_2, window_bounds = array<i64: 1, 256>}, {pipeline_mode = #tpu.pipeline_mode<synchronous>, transform_indices = @transform_3, window_bounds = array<i64: 1, 256>}, {transform_indices = @transform_4, window_bounds = array<i64: 1, 8, 16, 256>}]} {
    %c8_i32 = arith.constant 8 : i32
    %0 = arith.muli %arg1, %c8_i32 : i32
    %c0_i32 = arith.constant 0 : i32
    %1 = arith.addi %0, %c0_i32 : i32
    %c0 = arith.constant 0 : index
    %2 = arith.index_cast %1 : i32 to index
    %c0_0 = arith.constant 0 : index
    %c0_1 = arith.constant 0 : index
    %3 = vector.load %arg2[%c0, %2, %c0_0, %c0_1] : memref<1x18x18x16xf32, #tpu.memory_space<vmem>>, vector<1x8x16x16xf32>
    %4 = vector.shape_cast %3 : vector<1x8x16x16xf32> to vector<8x16x16xf32>
    %5 = vector.shape_cast %4 : vector<8x16x16xf32> to vector<128x16xf32>
    %c0_2 = arith.constant 0 : index
    %c0_3 = arith.constant 0 : index
    %c0_4 = arith.constant 0 : index
    %6 = vector.load %arg3[%c0_2, %c0_3, %c0_4] : memref<9x16x256xf32, #tpu.memory_space<vmem>>, vector<1x16x256xf32>
    %7 = vector.shape_cast %6 : vector<1x16x256xf32> to vector<16x256xf32>
    %cst = arith.constant dense<0.000000e+00> : vector<128x256xf32>
    %8 = tpu.matmul %5, %7, %cst {dimension_numbers = #tpu.dot_dimension_numbers<[1], [0], [0], [1], [0, 0, 1, 1], [], []>} : vector<128x16xf32>, vector<16x256xf32>, vector<128x256xf32> -> vector<128x256xf32>
    %c0_i32_5 = arith.constant 0 : i32
    %9 = arith.addi %0, %c0_i32_5 : i32
    %c0_6 = arith.constant 0 : index
    %10 = arith.index_cast %9 : i32 to index
    %c1 = arith.constant 1 : index
    %c0_7 = arith.constant 0 : index
    %11 = vector.load %arg2[%c0_6, %10, %c1, %c0_7] : memref<1x18x18x16xf32, #tpu.memory_space<vmem>>, vector<1x8x16x16xf32>
    %12 = vector.shape_cast %11 : vector<1x8x16x16xf32> to vector<8x16x16xf32>
    %13 = vector.shape_cast %12 : vector<8x16x16xf32> to vector<128x16xf32>
    %c1_8 = arith.constant 1 : index
    %c0_9 = arith.constant 0 : index
    %c0_10 = arith.constant 0 : index
    %14 = vector.load %arg3[%c1_8, %c0_9, %c0_10] : memref<9x16x256xf32, #tpu.memory_space<vmem>>, vector<1x16x256xf32>
    %15 = vector.shape_cast %14 : vector<1x16x256xf32> to vector<16x256xf32>
    %cst_11 = arith.constant dense<0.000000e+00> : vector<128x256xf32>
    %16 = tpu.matmul %13, %15, %cst_11 {dimension_numbers = #tpu.dot_dimension_numbers<[1], [0], [0], [1], [0, 0, 1, 1], [], []>} : vector<128x16xf32>, vector<16x256xf32>, vector<128x256xf32> -> vector<128x256xf32>
    %17 = arith.addf %8, %16 : vector<128x256xf32>
    %c0_i32_12 = arith.constant 0 : i32
    %18 = arith.addi %0, %c0_i32_12 : i32
    %c0_13 = arith.constant 0 : index
    %19 = arith.index_cast %18 : i32 to index
    %c2 = arith.constant 2 : index
    %c0_14 = arith.constant 0 : index
    %20 = vector.load %arg2[%c0_13, %19, %c2, %c0_14] : memref<1x18x18x16xf32, #tpu.memory_space<vmem>>, vector<1x8x16x16xf32>
    %21 = vector.shape_cast %20 : vector<1x8x16x16xf32> to vector<8x16x16xf32>
    %22 = vector.shape_cast %21 : vector<8x16x16xf32> to vector<128x16xf32>
    %c2_15 = arith.constant 2 : index
    %c0_16 = arith.constant 0 : index
    %c0_17 = arith.constant 0 : index
    %23 = vector.load %arg3[%c2_15, %c0_16, %c0_17] : memref<9x16x256xf32, #tpu.memory_space<vmem>>, vector<1x16x256xf32>
    %24 = vector.shape_cast %23 : vector<1x16x256xf32> to vector<16x256xf32>
    %cst_18 = arith.constant dense<0.000000e+00> : vector<128x256xf32>
    %25 = tpu.matmul %22, %24, %cst_18 {dimension_numbers = #tpu.dot_dimension_numbers<[1], [0], [0], [1], [0, 0, 1, 1], [], []>} : vector<128x16xf32>, vector<16x256xf32>, vector<128x256xf32> -> vector<128x256xf32>
    %26 = arith.addf %17, %25 : vector<128x256xf32>
    %c1_i32 = arith.constant 1 : i32
    %27 = arith.addi %0, %c1_i32 : i32
    %c0_19 = arith.constant 0 : index
    %28 = arith.index_cast %27 : i32 to index
    %c0_20 = arith.constant 0 : index
    %c0_21 = arith.constant 0 : index
    %29 = vector.load %arg2[%c0_19, %28, %c0_20, %c0_21] : memref<1x18x18x16xf32, #tpu.memory_space<vmem>>, vector<1x8x16x16xf32>
    %30 = vector.shape_cast %29 : vector<1x8x16x16xf32> to vector<8x16x16xf32>
    %31 = vector.shape_cast %30 : vector<8x16x16xf32> to vector<128x16xf32>
    %c3 = arith.constant 3 : index
    %c0_22 = arith.constant 0 : index
    %c0_23 = arith.constant 0 : index
    %32 = vector.load %arg3[%c3, %c0_22, %c0_23] : memref<9x16x256xf32, #tpu.memory_space<vmem>>, vector<1x16x256xf32>
    %33 = vector.shape_cast %32 : vector<1x16x256xf32> to vector<16x256xf32>
    %cst_24 = arith.constant dense<0.000000e+00> : vector<128x256xf32>
    %34 = tpu.matmul %31, %33, %cst_24 {dimension_numbers = #tpu.dot_dimension_numbers<[1], [0], [0], [1], [0, 0, 1, 1], [], []>} : vector<128x16xf32>, vector<16x256xf32>, vector<128x256xf32> -> vector<128x256xf32>
    %35 = arith.addf %26, %34 : vector<128x256xf32>
    %c1_i32_25 = arith.constant 1 : i32
    %36 = arith.addi %0, %c1_i32_25 : i32
    %c0_26 = arith.constant 0 : index
    %37 = arith.index_cast %36 : i32 to index
    %c1_27 = arith.constant 1 : index
    %c0_28 = arith.constant 0 : index
    %38 = vector.load %arg2[%c0_26, %37, %c1_27, %c0_28] : memref<1x18x18x16xf32, #tpu.memory_space<vmem>>, vector<1x8x16x16xf32>
    %39 = vector.shape_cast %38 : vector<1x8x16x16xf32> to vector<8x16x16xf32>
    %40 = vector.shape_cast %39 : vector<8x16x16xf32> to vector<128x16xf32>
    %c4 = arith.constant 4 : index
    %c0_29 = arith.constant 0 : index
    %c0_30 = arith.constant 0 : index
    %41 = vector.load %arg3[%c4, %c0_29, %c0_30] : memref<9x16x256xf32, #tpu.memory_space<vmem>>, vector<1x16x256xf32>
    %42 = vector.shape_cast %41 : vector<1x16x256xf32> to vector<16x256xf32>
    %cst_31 = arith.constant dense<0.000000e+00> : vector<128x256xf32>
    %43 = tpu.matmul %40, %42, %cst_31 {dimension_numbers = #tpu.dot_dimension_numbers<[1], [0], [0], [1], [0, 0, 1, 1], [], []>} : vector<128x16xf32>, vector<16x256xf32>, vector<128x256xf32> -> vector<128x256xf32>
    %44 = arith.addf %35, %43 : vector<128x256xf32>
    %c1_i32_32 = arith.constant 1 : i32
    %45 = arith.addi %0, %c1_i32_32 : i32
    %c0_33 = arith.constant 0 : index
    %46 = arith.index_cast %45 : i32 to index
    %c2_34 = arith.constant 2 : index
    %c0_35 = arith.constant 0 : index
    %47 = vector.load %arg2[%c0_33, %46, %c2_34, %c0_35] : memref<1x18x18x16xf32, #tpu.memory_space<vmem>>, vector<1x8x16x16xf32>
    %48 = vector.shape_cast %47 : vector<1x8x16x16xf32> to vector<8x16x16xf32>
    %49 = vector.shape_cast %48 : vector<8x16x16xf32> to vector<128x16xf32>
    %c5 = arith.constant 5 : index
    %c0_36 = arith.constant 0 : index
    %c0_37 = arith.constant 0 : index
    %50 = vector.load %arg3[%c5, %c0_36, %c0_37] : memref<9x16x256xf32, #tpu.memory_space<vmem>>, vector<1x16x256xf32>
    %51 = vector.shape_cast %50 : vector<1x16x256xf32> to vector<16x256xf32>
    %cst_38 = arith.constant dense<0.000000e+00> : vector<128x256xf32>
    %52 = tpu.matmul %49, %51, %cst_38 {dimension_numbers = #tpu.dot_dimension_numbers<[1], [0], [0], [1], [0, 0, 1, 1], [], []>} : vector<128x16xf32>, vector<16x256xf32>, vector<128x256xf32> -> vector<128x256xf32>
    %53 = arith.addf %44, %52 : vector<128x256xf32>
    %c2_i32 = arith.constant 2 : i32
    %54 = arith.addi %0, %c2_i32 : i32
    %c0_39 = arith.constant 0 : index
    %55 = arith.index_cast %54 : i32 to index
    %c0_40 = arith.constant 0 : index
    %c0_41 = arith.constant 0 : index
    %56 = vector.load %arg2[%c0_39, %55, %c0_40, %c0_41] : memref<1x18x18x16xf32, #tpu.memory_space<vmem>>, vector<1x8x16x16xf32>
    %57 = vector.shape_cast %56 : vector<1x8x16x16xf32> to vector<8x16x16xf32>
    %58 = vector.shape_cast %57 : vector<8x16x16xf32> to vector<128x16xf32>
    %c6 = arith.constant 6 : index
    %c0_42 = arith.constant 0 : index
    %c0_43 = arith.constant 0 : index
    %59 = vector.load %arg3[%c6, %c0_42, %c0_43] : memref<9x16x256xf32, #tpu.memory_space<vmem>>, vector<1x16x256xf32>
    %60 = vector.shape_cast %59 : vector<1x16x256xf32> to vector<16x256xf32>
    %cst_44 = arith.constant dense<0.000000e+00> : vector<128x256xf32>
    %61 = tpu.matmul %58, %60, %cst_44 {dimension_numbers = #tpu.dot_dimension_numbers<[1], [0], [0], [1], [0, 0, 1, 1], [], []>} : vector<128x16xf32>, vector<16x256xf32>, vector<128x256xf32> -> vector<128x256xf32>
    %62 = arith.addf %53, %61 : vector<128x256xf32>
    %c2_i32_45 = arith.constant 2 : i32
    %63 = arith.addi %0, %c2_i32_45 : i32
    %c0_46 = arith.constant 0 : index
    %64 = arith.index_cast %63 : i32 to index
    %c1_47 = arith.constant 1 : index
    %c0_48 = arith.constant 0 : index
    %65 = vector.load %arg2[%c0_46, %64, %c1_47, %c0_48] : memref<1x18x18x16xf32, #tpu.memory_space<vmem>>, vector<1x8x16x16xf32>
    %66 = vector.shape_cast %65 : vector<1x8x16x16xf32> to vector<8x16x16xf32>
    %67 = vector.shape_cast %66 : vector<8x16x16xf32> to vector<128x16xf32>
    %c7 = arith.constant 7 : index
    %c0_49 = arith.constant 0 : index
    %c0_50 = arith.constant 0 : index
    %68 = vector.load %arg3[%c7, %c0_49, %c0_50] : memref<9x16x256xf32, #tpu.memory_space<vmem>>, vector<1x16x256xf32>
    %69 = vector.shape_cast %68 : vector<1x16x256xf32> to vector<16x256xf32>
    %cst_51 = arith.constant dense<0.000000e+00> : vector<128x256xf32>
    %70 = tpu.matmul %67, %69, %cst_51 {dimension_numbers = #tpu.dot_dimension_numbers<[1], [0], [0], [1], [0, 0, 1, 1], [], []>} : vector<128x16xf32>, vector<16x256xf32>, vector<128x256xf32> -> vector<128x256xf32>
    %71 = arith.addf %62, %70 : vector<128x256xf32>
    %c2_i32_52 = arith.constant 2 : i32
    %72 = arith.addi %0, %c2_i32_52 : i32
    %c0_53 = arith.constant 0 : index
    %73 = arith.index_cast %72 : i32 to index
    %c2_54 = arith.constant 2 : index
    %c0_55 = arith.constant 0 : index
    %74 = vector.load %arg2[%c0_53, %73, %c2_54, %c0_55] : memref<1x18x18x16xf32, #tpu.memory_space<vmem>>, vector<1x8x16x16xf32>
    %75 = vector.shape_cast %74 : vector<1x8x16x16xf32> to vector<8x16x16xf32>
    %76 = vector.shape_cast %75 : vector<8x16x16xf32> to vector<128x16xf32>
    %c8 = arith.constant 8 : index
    %c0_56 = arith.constant 0 : index
    %c0_57 = arith.constant 0 : index
    %77 = vector.load %arg3[%c8, %c0_56, %c0_57] : memref<9x16x256xf32, #tpu.memory_space<vmem>>, vector<1x16x256xf32>
    %78 = vector.shape_cast %77 : vector<1x16x256xf32> to vector<16x256xf32>
    %cst_58 = arith.constant dense<0.000000e+00> : vector<128x256xf32>
    %79 = tpu.matmul %76, %78, %cst_58 {dimension_numbers = #tpu.dot_dimension_numbers<[1], [0], [0], [1], [0, 0, 1, 1], [], []>} : vector<128x16xf32>, vector<16x256xf32>, vector<128x256xf32> -> vector<128x256xf32>
    %80 = arith.addf %71, %79 : vector<128x256xf32>
    %c0_59 = arith.constant 0 : index
    %c0_60 = arith.constant 0 : index
    %81 = vector.load %arg4[%c0_59, %c0_60] : memref<1x256xf32, #tpu.memory_space<vmem>>, vector<1x256xf32>
    %82 = vector.broadcast %81 : vector<1x256xf32> to vector<128x256xf32>
    %83 = arith.addf %80, %82 : vector<128x256xf32>
    %cst_61 = arith.constant 0.000000e+00 : f32
    %84 = vector.broadcast %cst_61 : f32 to vector<128x256xf32>
    %85 = arith.cmpf oge, %83, %84 : vector<128x256xf32>
    %c0_62 = arith.constant 0 : index
    %c0_63 = arith.constant 0 : index
    %86 = vector.load %arg5[%c0_62, %c0_63] : memref<1x256xf32, #tpu.memory_space<vmem>>, vector<1x256xf32>
    %87 = vector.broadcast %86 : vector<1x256xf32> to vector<128x256xf32>
    %88 = arith.mulf %87, %83 : vector<128x256xf32>
    %89 = arith.select %85, %83, %88 : vector<128x256xi1>, vector<128x256xf32>
    %90 = vector.shape_cast %89 : vector<128x256xf32> to vector<8x16x256xf32>
    %c0_64 = arith.constant 0 : index
    %c0_65 = arith.constant 0 : index
    %c0_66 = arith.constant 0 : index
    %c0_67 = arith.constant 0 : index
    %91 = vector.load %arg6[%c0_64, %c0_65, %c0_66, %c0_67] : memref<1x8x16x256xf32, #tpu.memory_space<vmem>>, vector<1x8x16x256xf32>
    %92 = vector.shape_cast %91 : vector<1x8x16x256xf32> to vector<8x16x256xf32>
    %93 = vector.shape_cast %90 : vector<8x16x256xf32> to vector<1x8x16x256xf32>
    tpu.vector_store %arg6[%c0_64, %c0_65, %c0_66, %c0_67], %93 {strides = array<i32>} : memref<1x8x16x256xf32, #tpu.memory_space<vmem>>, vector<1x8x16x256xf32>,
    return
  }
  func.func @transform_0(%arg0: i32, %arg1: i32) -> (i32, i32, i32, i32) {
    %c0_i32 = arith.constant 0 : i32
    %c0_i32_0 = arith.constant 0 : i32
    %c0_i32_1 = arith.constant 0 : i32
    %c0_i32_2 = arith.constant 0 : i32
    return %arg0, %c0_i32, %c0_i32_0, %c0_i32_1 : i32, i32, i32, i32
  }
  func.func @transform_1(%arg0: i32, %arg1: i32) -> (i32, i32, i32) {
    %c0_i32 = arith.constant 0 : i32
    %c0_i32_0 = arith.constant 0 : i32
    %c0_i32_1 = arith.constant 0 : i32
    %c0_i32_2 = arith.constant 0 : i32
    return %c0_i32, %c0_i32_0, %c0_i32_1 : i32, i32, i32
  }
  func.func @transform_2(%arg0: i32, %arg1: i32) -> (i32, i32) {
    %c0_i32 = arith.constant 0 : i32
    %c0_i32_0 = arith.constant 0 : i32
    %c0_i32_1 = arith.constant 0 : i32
    return %c0_i32, %c0_i32_0 : i32, i32
  }
  func.func @transform_3(%arg0: i32, %arg1: i32) -> (i32, i32) {
    %c0_i32 = arith.constant 0 : i32
    %c0_i32_0 = arith.constant 0 : i32
    %c0_i32_1 = arith.constant 0 : i32
    return %c0_i32, %c0_i32_0 : i32, i32
  }
  func.func @transform_4(%arg0: i32, %arg1: i32) -> (i32, i32, i32, i32) {
    %c0_i32 = arith.constant 0 : i32
    %c0_i32_0 = arith.constant 0 : i32
    %c0_i32_1 = arith.constant 0 : i32
    return %arg0, %arg1, %c0_i32, %c0_i32_0 : i32, i32, i32, i32
  }
}

</mosaic_0001>

<bundles_post_ra>
// kernel: tile.8
= control target key start
LH: loop header
LB: loop body
LE: loop exit
PB: predicated region body
PF: predicated region fallthrough
CT: control target
= control target key end

     0   :  { %2 = vsyncpa [#allocation1], 0  ;;  %s48_s8 = smov [#allocation0]   ;;  %s65_s0 = inlined_call_operand.hbm [shape: f32[64], index: 0, kind: input, shape index: {}]   ;;  %s66_s1 = inlined_call_operand.vmem [shape: f32[4,64], index: 1, kind: output, shape index: {}]  }
   0x1   :  { %s8_s0 = sshll.u32 %s65_s0, 4  ;;  %s10_s9 = sshll.u32 %s48_s8, 4  ;;  %s9_s0 = int_to_ptr.hbm [resolvable:$true] %s8_s0  ;;  %s11_s9 = int_to_ptr.vmem [resolvable:$true] %s10_s9 }
   0x2   :  { %13 = dma.hbm_to_vmem [thread:$0]  %s9_s0, 16, %s11_s9, [#allocation1]  }
   0x3   :  { %46 = dma.done.wait [#allocation1], 16  }
   0x4   :  { %47 = vsyncadd [#allocation1], 4294967280  ;;  %v18_v0 = vld [vmem:[#allocation0] ss:$0 sm:$0xff] }
   0x5   :  { %19 = vst [vmem:[%s66_s1] sm:$0xf] %v18_v0 }
   0x6   :  { %20 = vsyncpa [#allocation1], 1 }

// kernel: tile.9
= control target key start
LH: loop header
LB: loop body
LE: loop exit
PB: predicated region body
PF: predicated region fallthrough
CT: control target
= control target key end

     0   :  { %s6_s8 = smov 3  ;;  %vm8_vm0 = vcmask 523264   ;;  %s31_s9 = smov 64   ;;  %vm15_vm1 = vcmask 1048064   ;;  %s51_s0 = inlined_call_operand.vmem [shape: f32[4,64], index: 0, kind: input, shape index: {}]   ;;  %s52_s1 = inlined_call_operand.vmem [shape: f32[1,256], index: 1, kind: output, shape index: {}]  }
   0x1   :  { %v4_v0 = vld [vmem:[%s51_s0] sm:$0xf]  ;;  %s11_s0 = smov 3 }
   0x2   :  { %5 = vst [vmem:[#allocation1] sm:$0xf] %v4_v0 }
   0x9   :  { %v12_v1 = vld [vmem:[#allocation1 + $0x1] ss:$2 sm:%s11_s0]   ;;  %v7_v2 = vld [vmem:[#allocation1] ss:$2 sm:%s6_s8]  }
   0xa   :  { %13 = vrot.lane.b32.xlu0 %v12_v1, %s31_s9  ;;  %9 = vst.msk [vmem:[#allocation0] ss:$8 sm:$0x3] %vm8_vm0, %v7_v2  }
  0x7c   :  { %v14_v3 = vpop.permute.xlu0 %13  }
  0x7d   :  { %16 = vst.msk [vmem:[#allocation0] ss:$8 sm:$0x3] %vm15_vm1, %v14_v3  }
  0x84   :  { %v19_v4 = vld [vmem:[#allocation0] sm:$0x1]  ;;  %v24_v5 = vld [vmem:[#allocation0 + $0x8] sm:$0x1] }
  0x85   :  { %22 = vst [vmem:[%s52_s1] sm:$0x1] %v19_v4 }
  0x86   :  { %29 = vst [vmem:[%s52_s1 + $0x1] sm:$0x1] %v24_v5 }

// kernel: subpixel_block.1
= control target key start
LH: loop header
LB: loop body
LE: loop exit
PB: predicated region body
PF: predicated region fallthrough
CT: control target
= control target key end

     0   :  { %s3063_s15 = smov 0   ;;  %s3065_s16 = smov 0   ;;  %s4412_s0 = inlined_call_operand.vmem [shape: f32[2,18,18,16], index: 0, kind: input, shape index: {}]   ;;  %s4413_s1 = inlined_call_operand.vmem [shape: f32[9,16,256], index: 1, kind: input, shape index: {}]   ;;  %s4414_s2 = inlined_call_operand.vmem [shape: f32[1,256], index: 2, kind: input, shape index: {}]   ;;  %s4415_s3 = inlined_call_operand.vmem [shape: f32[1,256], index: 3, kind: input, shape index: {}]   ;;  %s4416_s4 = inlined_call_operand.vmem [shape: f32[2,16,16,256], index: 4, kind: output, shape index: {}]  }
   0x1   :  { %s3067_s17 = smov 0   ;;  %s3069_s18 = smov 0  }
   0x2   :  { %s3071_s19 = smov 0  }
   0x3 LB: > { %s23_s20 = sadd.s32 1, %s3028_s17  ;;  %s26_s21 = sadd.s32 1, %s3032_s18  ;;  %s3036_s19 = sphi %s3071_s19, %s14_s19   ;;  %s3032_s18 = sphi %s3069_s18, %s4488_s18   ;;  %s3028_s17 = sphi %s3067_s17, %s4487_s17   ;;  %s3024_s16 = sphi %s3065_s16, %s4486_s16   ;;  %s3020_s15 = sphi %s3063_s15, %s4485_s15  }
   0x4   : > { %p24_p0 = scmp.ge.s32.totalorder %s23_s20, 2  ;;  %p2523_p1 = scmp.ge.s32.totalorder %s3036_s19, 1 }
   0x5   : > { %p176_p2 = scmp.lt.s32.totalorder %s3036_s19, 5 }
   0x6   : > { %s4490_s20 = smov (%p24_p0, %s23_s20), 0  ;;  %s4492_s21 = smov (!%p24_p0, %s26_s21), %s3032_s18 }
   0x7   : > { %p177_p3 = pnand %p2523_p1, %p176_p2  ;;  %p28_p4 = scmp.ge.s32.totalorder %s4492_s21, 2 }
   0x9   : > { %s4494_s21 = smov (%p28_p4, %s4492_s21), 0  ;;  %180 = sbr.rel (%p177_p3) target bundleno = 733 (0x2dd), region = 36 }
   0xe   : > { %v2533_v0 = vld [vmem:[%s4413_s1 + $0x30] sm:$0xff]  ;;  %v2534_v1 = vld [vmem:[%s4413_s1 + $0x38] sm:$0xff]  ;;  %v2531_v2 = vld [vmem:[%s4413_s1 + $0x20] sm:$0xff]  ;;  %p207_p5 = scmp.lt.s32.totalorder %s3024_s16, 1  ;;  %s2530_s8 = smul.u32 192, %s3020_s15  ;;  %vm267_vm0 = vcmask 130048  }
   0xf   : > { %2953 = vmatpush.msra.mxu2 %v2533_v0  ;;  %2955 = vmatpush.msra.mxu3 %v2534_v1  ;;  %v2532_v3 = vld [vmem:[%s4413_s1 + $0x28] sm:$0xff]  ;;  %v244_v4 = vld [vmem:[%s4413_s1 + $0x10] sm:$0xff]  ;;  %v245_v5 = vld [vmem:[%s4413_s1 + $0x18] sm:$0xff]  ;;  %s2525_s27 = sshll.u32 %s3020_s15, 3 }
  0x10   : > { %s4496_s16 = smov (!%p207_p5, %s3024_s16), 1  ;;  %330 = vmatpush.msra.mxu0 %v2533_v0  ;;  %395 = vmatpush.msra.mxu1 %v2534_v1  ;;  %v2601_v6 = vld [vmem:[%s4413_s1 + $0x50] sm:$0xff]  ;;  %v2602_v7 = vld [vmem:[%s4413_s1 + $0x58] sm:$0xff]  ;;  %v242_v10 = vld [vmem:[%s4413_s1] sm:$0xff]  ;;  %p215_p6 = scmp.lt.s32.totalorder %s2525_s27, 15 }
  0x11   : > { %2954 = vmatpush.msra.mxu2 %v2531_v2  ;;  %2956 = vmatpush.msra.mxu3 %v2532_v3  ;;  %s2957_s13 = smul.u32 432, %s4496_s16  ;;  %v243_v11 = vld [vmem:[%s4413_s1 + $0x8] sm:$0xff]  ;;  %v2599_v14 = vld [vmem:[%s4413_s1 + $0x40] sm:$0xff]  ;;  %v2655_v22 = vld [vmem:[%s4413_s1 + $0x70] sm:$0xff] }
  0x12   : > { %331 = vmatpush.msra.mxu0 %v2531_v2  ;;  %396 = vmatpush.msra.mxu1 %v2532_v3  ;;  %v2600_v15 = vld [vmem:[%s4413_s1 + $0x48] sm:$0xff]  ;;  %v2656_v23 = vld [vmem:[%s4413_s1 + $0x78] sm:$0xff]  ;;  %v2707_v26 = vld [vmem:[%s4413_s1 + $0x90] sm:$0xff]  ;;  %s4498_s27 = smov (!%p215_p6, %s2525_s27), 15 }
  0x13   : > { %508 = vmatpush.msrb.mxu2 %v244_v4  ;;  %573 = vmatpush.msrb.mxu3 %v245_v5  ;;  %s211_s23 = scalar_lea.vmem %s4412_s0, %s2957_s13  ;;  %v2708_v27 = vld [vmem:[%s4413_s1 + $0x98] sm:$0xff]  ;;  %v2653_v42 = vld [vmem:[%s4413_s1 + $0x60] sm:$0xff]  ;;  %v2654_v43 = vld [vmem:[%s4413_s1 + $0x68] sm:$0xff]  ;;  %s2526_s15 = sshll.u32 %s4498_s27, 2 }
  0x14   : > { %707 = vmatpush.msrb.mxu0 %v2601_v6  ;;  %772 = vmatpush.msrb.mxu1 %v2602_v7  ;;  %s3126_s24 = scalar_lea.vmem %s211_s23, %s2530_s8  ;;  %v2705_v46 = vld [vmem:[%s4413_s1 + $0x80] sm:$0xff]  ;;  %v2706_v47 = vld [vmem:[%s4413_s1 + $0x88] sm:$0xff] }
  0x15   : > { %v3129_v8 = vld [vmem:[%s3126_s24 + $0x61] sm:$0xff]  ;;  %509 = vmatpush.msrb.mxu2 %v242_v10  ;;  %574 = vmatpush.msrb.mxu3 %v243_v11  ;;  %v3145_v12 = vld [vmem:[%s3126_s24 + $0x69] sm:$0xff]  ;;  %v3161_v16 = vld [vmem:[%s3126_s24 + $0x79] sm:$0xff] }
  0x16   : > { %v246_v9 = vld [vmem:[%s3126_s24 + $0x1] sm:$0xff]  ;;  %2543 = vmatmul.msk.f32.vlgmr.msra.gmra.mxu2 %vm267_vm0, %v3129_v8  ;;  %2559 = vmatmul.msk.f32.vlgmr.msra.gmra.mxu3 %vm267_vm0, %v3129_v8  ;;  %v247_v13 = vld [vmem:[%s3126_s24 + $0x9] sm:$0xff]  ;;  %v3164_v17 = vld [vmem:[%s3126_s24 + $0x19] sm:$0xff] }
  0x17   : > { %2535 = vmatmul.msk.f32.vlgmr.msra.gmra.mxu0 %vm267_vm0, %v246_v9  ;;  %2551 = vmatmul.msk.f32.vlgmr.msra.gmra.mxu1 %vm267_vm0, %v246_v9  ;;  %v3175_v18 = vld [vmem:[%s3126_s24 + $0x81] sm:$0xff]  ;;  %v3189_v20 = vld [vmem:[%s3126_s24 + $0x91] sm:$0xff]  ;;  %v3209_v24 = vld [vmem:[%s3126_s24 + $0x99] sm:$0xff] }
  0x18   : > { %708 = vmatpush.msrb.mxu0 %v2599_v14  ;;  %773 = vmatpush.msrb.mxu1 %v2600_v15  ;;  %v3178_v19 = vld [vmem:[%s3126_s24 + $0x21] sm:$0xff]  ;;  %v3192_v21 = vld [vmem:[%s3126_s24 + $0x31] sm:$0xff]  ;;  %v3212_v25 = vld [vmem:[%s3126_s24 + $0x39] sm:$0xff] }
  0x19   : > { %941 = vmatpush.msra.mxu2 %v2655_v22  ;;  %1006 = vmatpush.msra.mxu3 %v2656_v23  ;;  %v3229_v28 = vld [vmem:[%s3126_s24 + $0xa9] sm:$0xff]  ;;  %v3243_v30 = vld [vmem:[%s3126_s24 + $0xb1] sm:$0xff]  ;;  %v226_v32 = vld [vmem:[%s3126_s24] sm:$0xff] }
  0x1a   : > { %1172 = vmatpush.msra.mxu0 %v2707_v26  ;;  %1237 = vmatpush.msra.mxu1 %v2708_v27  ;;  %v3232_v29 = vld [vmem:[%s3126_s24 + $0x49] sm:$0xff]  ;;  %v3246_v31 = vld [vmem:[%s3126_s24 + $0x51] sm:$0xff]  ;;  %v3272_v37 = vld [vmem:[%s3126_s24 + $0x1a] sm:$0xff] }
  0x1b   : > { %v624_v33 = vld [vmem:[%s3126_s24 + $0x2] sm:$0xff]  ;;  %v625_v35 = vld [vmem:[%s3126_s24 + $0xa] sm:$0xff]  ;;  %v3269_v36 = vld [vmem:[%s3126_s24 + $0x18] sm:$0xff]  ;;  %4445 = vst [vmem:[#allocation2_spill] sm:$0xff] %v3272_v37  ;;  %942 = vmatpush.msra.mxu2 %v2653_v42  ;;  %1007 = vmatpush.msra.mxu3 %v2654_v43 }
  0x1c   : > { %v227_v34 = vld [vmem:[%s3126_s24 + $0x8] sm:$0xff]  ;;  %v3283_v38 = vld [vmem:[%s3126_s24 + $0x20] sm:$0xff]  ;;  %v3297_v40 = vld [vmem:[%s3126_s24 + $0x30] sm:$0xff]  ;;  %1173 = vmatpush.msra.mxu0 %v2705_v46  ;;  %1238 = vmatpush.msra.mxu1 %v2706_v47 }
  0x1d   : > { %v3286_v39 = vld [vmem:[%s3126_s24 + $0x22] sm:$0xff]  ;;  %v3300_v41 = vld [vmem:[%s3126_s24 + $0x32] sm:$0xff]  ;;  %v3320_v45 = vld [vmem:[%s3126_s24 + $0x3a] sm:$0xff] }
  0x1e   : > { %2544 = vmatmul.msk.f32.gmra.mxu2 %vm267_vm0, %v3145_v12  ;;  %2560 = vmatmul.msk.f32.gmra.mxu3 %vm267_vm0, %v3145_v12  ;;  %4446 = vst [vmem:[#allocation3_spill] sm:$0xff] %v3286_v39  ;;  %v3317_v44 = vld [vmem:[%s3126_s24 + $0x38] sm:$0xff]  ;;  %v3337_v48 = vld [vmem:[%s3126_s24 + $0x48] sm:$0xff]  ;;  %v3351_v50 = vld [vmem:[%s3126_s24 + $0x50] sm:$0xff] }
  0x1f   : > { %2536 = vmatmul.msk.f32.gmra.mxu0 %vm267_vm0, %v247_v13  ;;  %2552 = vmatmul.msk.f32.gmra.mxu1 %vm267_vm0, %v247_v13  ;;  %4447 = vst [vmem:[#allocation4_spill] sm:$0xff] %v3300_v41  ;;  %v3340_v49 = vld [vmem:[%s3126_s24 + $0x4a] sm:$0xff]  ;;  %v3354_v51 = vld [vmem:[%s3126_s24 + $0x52] sm:$0xff]  ;;  %v3365_v52 = vld [vmem:[%s3126_s24 + $0x60] sm:$0xff] }
  0x20   : > { %4448 = vst [vmem:[#allocation5_spill] sm:$0xff] %v3320_v45  ;;  %v3372_v55 = vld [vmem:[%s3126_s24 + $0x62] sm:$0xff]  ;;  %v3394_v61 = vld [vmem:[%s3126_s24 + $0x6a] sm:$0xff]  ;;  %v3409_v0 = vld [vmem:[%s3126_s24 + $0x78] sm:$0xff] }
  0x21   : > { %4449 = vst [vmem:[#allocation6_spill] sm:$0xff] %v3340_v49  ;;  %v3387_v58 = vld [vmem:[%s3126_s24 + $0x68] sm:$0xff]  ;;  %v3416_v3 = vld [vmem:[%s3126_s24 + $0x7a] sm:$0xff]  ;;  %v3453_v14 = vld [vmem:[%s3126_s24 + $0x90] sm:$0xff] }
  0x22   : > { %4450 = vst [vmem:[#allocation7_spill] sm:$0xff] %v3354_v51  ;;  %v3431_v6 = vld [vmem:[%s3126_s24 + $0x80] sm:$0xff]  ;;  %v3460_v23 = vld [vmem:[%s3126_s24 + $0x92] sm:$0xff] }
  0x23   : > { %4451 = vst [vmem:[#allocation8_spill] sm:$0xff] %v3372_v55  ;;  %v3438_v10 = vld [vmem:[%s3126_s24 + $0x82] sm:$0xff]  ;;  %v2759_v26 = vld [vmem:[%s4413_s1 + $0xb0] sm:$0xff]  ;;  %v2760_v27 = vld [vmem:[%s4413_s1 + $0xb8] sm:$0xff] }
  0x24   : > { %4452 = vst [vmem:[#allocation9_spill] sm:$0xff] %v3394_v61  ;;  %v3488_v43 = vld [vmem:[%s3126_s24 + $0x9a] sm:$0xff]  ;;  %v2813_v46 = vld [vmem:[%s4413_s1 + $0xd0] sm:$0xff] }
  0x25   : > { %4453 = vst [vmem:[#allocation10_spill] sm:$0xff] %v3416_v3  ;;  %v2814_v47 = vld [vmem:[%s4413_s1 + $0xd8] sm:$0xff] }
  0x26   : > { %2545 = vmatmul.msk.f32.gmra.mxu2 %vm267_vm0, %v3161_v16  ;;  %2561 = vmatmul.msk.f32.gmra.mxu3 %vm267_vm0, %v3161_v16  ;;  %4454 = vst [vmem:[#allocation11_spill] sm:$0xff] %v3438_v10 }
  0x27   : > { %2537 = vmatmul.msk.f32.gmra.mxu0 %vm267_vm0, %v3164_v17  ;;  %2553 = vmatmul.msk.f32.gmra.mxu1 %vm267_vm0, %v3164_v17  ;;  %4455 = vst [vmem:[#allocation12_spill] sm:$0xff] %v3460_v23 }
  0x28   : > { %4456 = vst [vmem:[#allocation13_spill] sm:$0xff] %v3488_v43 }
  0x2e   : > { %2546 = vmatmul.msk.f32.gmra.mxu2 %vm267_vm0, %v3175_v18  ;;  %2562 = vmatmul.msk.f32.gmra.mxu3 %vm267_vm0, %v3175_v18 }
  0x2f   : > { %2538 = vmatmul.msk.f32.gmra.mxu0 %vm267_vm0, %v3178_v19  ;;  %2554 = vmatmul.msk.f32.gmra.mxu1 %vm267_vm0, %v3178_v19 }
  0x36   : > { %2547 = vmatmul.msk.f32.gmra.mxu2 %vm267_vm0, %v3189_v20  ;;  %2563 = vmatmul.msk.f32.gmra.mxu3 %vm267_vm0, %v3189_v20 }
  0x37   : > { %2539 = vmatmul.msk.f32.gmra.mxu0 %vm267_vm0, %v3192_v21  ;;  %2555 = vmatmul.msk.f32.gmra.mxu1 %vm267_vm0, %v3192_v21 }
  0x3e   : > { %2548 = vmatmul.msk.f32.gmra.mxu2 %vm267_vm0, %v3209_v24  ;;  %2564 = vmatmul.msk.f32.gmra.mxu3 %vm267_vm0, %v3209_v24 }
  0x3f   : > { %2540 = vmatmul.msk.f32.gmra.mxu0 %vm267_vm0, %v3212_v25  ;;  %2556 = vmatmul.msk.f32.gmra.mxu1 %vm267_vm0, %v3212_v25 }
  0x46   : > { %2549 = vmatmul.msk.f32.gmra.mxu2 %vm267_vm0, %v3229_v28  ;;  %2565 = vmatmul.msk.f32.gmra.mxu3 %vm267_vm0, %v3229_v28 }
  0x47   : > { %2541 = vmatmul.msk.f32.gmra.mxu0 %vm267_vm0, %v3232_v29  ;;  %2557 = vmatmul.msk.f32.gmra.mxu1 %vm267_vm0, %v3232_v29 }
  0x4e   : > { %2550 = vmatmul.msk.f32.gmra.mxu2 %vm267_vm0, %v3243_v30  ;;  %2566 = vmatmul.msk.f32.gmra.mxu3 %vm267_vm0, %v3243_v30 }
  0x4f   : > { %2542 = vmatmul.msk.f32.gmra.mxu0 %vm267_vm0, %v3246_v31  ;;  %2558 = vmatmul.msk.f32.gmra.mxu1 %vm267_vm0, %v3246_v31 }
  0x56   : > { %2567 = vmatmul.msk.f32.vlgmr.msrb.gmra.mxu2 %vm267_vm0, %v226_v32  ;;  %2583 = vmatmul.msk.f32.vlgmr.msrb.gmra.mxu3 %vm267_vm0, %v226_v32 }
  0x57   : > { %2603 = vmatmul.msk.f32.vlgmr.msrb.gmra.mxu0 %vm267_vm0, %v624_v33  ;;  %2619 = vmatmul.msk.f32.vlgmr.msrb.gmra.mxu1 %vm267_vm0, %v624_v33 }
  0x58   : > { %1403 = vmatpush.msrb.mxu2 %v2759_v26  ;;  %1468 = vmatpush.msrb.mxu3 %v2760_v27 }
  0x59   : > { %1637 = vmatpush.msrb.mxu0 %v2813_v46  ;;  %1702 = vmatpush.msrb.mxu1 %v2814_v47 }
  0x5e   : > { %2568 = vmatmul.msk.f32.gmra.mxu2 %vm267_vm0, %v227_v34  ;;  %2584 = vmatmul.msk.f32.gmra.mxu3 %vm267_vm0, %v227_v34  ;;  %v3481_v34 = vld [vmem:[%s3126_s24 + $0x98] sm:$0xff] }
  0x5f   : > { %2604 = vmatmul.msk.f32.gmra.mxu0 %vm267_vm0, %v625_v35  ;;  %2620 = vmatmul.msk.f32.gmra.mxu1 %vm267_vm0, %v625_v35 }
  0x66   : > { %2569 = vmatmul.msk.f32.gmra.mxu2 %vm267_vm0, %v3269_v36  ;;  %2585 = vmatmul.msk.f32.gmra.mxu3 %vm267_vm0, %v3269_v36 }
  0x67   : > { %2605 = vmatmul.msk.f32.gmra.mxu0 %vm267_vm0, %v3272_v37  ;;  %2621 = vmatmul.msk.f32.gmra.mxu1 %vm267_vm0, %v3272_v37 }
  0x6e   : > { %2570 = vmatmul.msk.f32.gmra.mxu2 %vm267_vm0, %v3283_v38  ;;  %2586 = vmatmul.msk.f32.gmra.mxu3 %vm267_vm0, %v3283_v38 }
  0x6f   : > { %2606 = vmatmul.msk.f32.gmra.mxu0 %vm267_vm0, %v3286_v39  ;;  %2622 = vmatmul.msk.f32.gmra.mxu1 %vm267_vm0, %v3286_v39 }
  0x76   : > { %2571 = vmatmul.msk.f32.gmra.mxu2 %vm267_vm0, %v3297_v40  ;;  %2587 = vmatmul.msk.f32.gmra.mxu3 %vm267_vm0, %v3297_v40 }
  0x77   : > { %2607 = vmatmul.msk.f32.gmra.mxu0 %vm267_vm0, %v3300_v41  ;;  %2623 = vmatmul.msk.f32.gmra.mxu1 %vm267_vm0, %v3300_v41 }
  0x7e   : > { %2572 = vmatmul.msk.f32.gmra.mxu2 %vm267_vm0, %v3317_v44  ;;  %2588 = vmatmul.msk.f32.gmra.mxu3 %vm267_vm0, %v3317_v44 }
  0x7f   : > { %2608 = vmatmul.msk.f32.gmra.mxu0 %vm267_vm0, %v3320_v45  ;;  %2624 = vmatmul.msk.f32.gmra.mxu1 %vm267_vm0, %v3320_v45 }
  0x86   : > { %2573 = vmatmul.msk.f32.gmra.mxu2 %vm267_vm0, %v3337_v48  ;;  %2589 = vmatmul.msk.f32.gmra.mxu3 %vm267_vm0, %v3337_v48 }
  0x87   : > { %2609 = vmatmul.msk.f32.gmra.mxu0 %vm267_vm0, %v3340_v49  ;;  %2625 = vmatmul.msk.f32.gmra.mxu1 %vm267_vm0, %v3340_v49  ;;  %v3538_v49 = vld [vmem:[%s3126_s24 + $0xb2] sm:$0xff] }
  0x88   : > { %4462 = vst [vmem:[#allocation19_spill] sm:$0xff] %v3538_v49 }
  0x8e   : > { %2574 = vmatmul.msk.f32.gmra.mxu2 %vm267_vm0, %v3351_v50  ;;  %2590 = vmatmul.msk.f32.gmra.mxu3 %vm267_vm0, %v3351_v50 }
  0x8f   : > { %2610 = vmatmul.msk.f32.gmra.mxu0 %vm267_vm0, %v3354_v51  ;;  %2626 = vmatmul.msk.f32.gmra.mxu1 %vm267_vm0, %v3354_v51 }
  0x94   : > { %v3367_v53 = vpop.f32.mrf.mxu0  ;;  %v3369_v54 = vpop.f32.mrf.mxu1 }
  0x96   : > { %2575 = vmatmul.msk.f32.gmra.mxu2 %vm267_vm0, %v3365_v52  ;;  %2591 = vmatmul.msk.f32.gmra.mxu3 %vm267_vm0, %v3365_v52 }
  0x97   : > { %2611 = vmatmul.msk.f32.gmra.mxu0 %vm267_vm0, %v3372_v55  ;;  %2627 = vmatmul.msk.f32.gmra.mxu1 %vm267_vm0, %v3372_v55 }
  0x99   : > { %v3382_v56 = vpop.f32.mrf.mxu2  ;;  %v3384_v57 = vpop.f32.mrf.mxu3 }
  0x9c   : > { %v3389_v59 = vpop.f32.mrf.mxu0  ;;  %v3391_v60 = vpop.f32.mrf.mxu1 }
  0x9e   : > { %2576 = vmatmul.msk.f32.gmra.mxu2 %vm267_vm0, %v3387_v58  ;;  %2592 = vmatmul.msk.f32.gmra.mxu3 %vm267_vm0, %v3387_v58 }
  0x9f   : > { %2612 = vmatmul.msk.f32.gmra.mxu0 %vm267_vm0, %v3394_v61  ;;  %2628 = vmatmul.msk.f32.gmra.mxu1 %vm267_vm0, %v3394_v61  ;;  %v3516_v61 = vld [vmem:[%s3126_s24 + $0xaa] sm:$0xff] }
  0xa0   : > { %4459 = vst [vmem:[#allocation16_spill] sm:$0xff] %v3516_v61 }
  0xa1   : > { %v3404_v62 = vpop.f32.mrf.mxu2  ;;  %v3406_v63 = vpop.f32.mrf.mxu3 }
  0xa4   : > { %v3411_v1 = vpop.f32.mrf.mxu0  ;;  %v3413_v2 = vpop.f32.mrf.mxu1 }
  0xa6   : > { %2577 = vmatmul.msk.f32.gmra.mxu2 %vm267_vm0, %v3409_v0  ;;  %2593 = vmatmul.msk.f32.gmra.mxu3 %vm267_vm0, %v3409_v0 }
  0xa7   : > { %2613 = vmatmul.msk.f32.gmra.mxu0 %vm267_vm0, %v3416_v3  ;;  %2629 = vmatmul.msk.f32.gmra.mxu1 %vm267_vm0, %v3416_v3 }
  0xa9   : > { %v3426_v4 = vpop.f32.mrf.mxu2  ;;  %v3428_v5 = vpop.f32.mrf.mxu3 }
  0xac   : > { %v3433_v7 = vpop.f32.mrf.mxu0  ;;  %v3435_v9 = vpop.f32.mrf.mxu1 }
  0xae   : > { %2578 = vmatmul.msk.f32.gmra.mxu2 %vm267_vm0, %v3431_v6  ;;  %2594 = vmatmul.msk.f32.gmra.mxu3 %vm267_vm0, %v3431_v6 }
  0xaf   : > { %2614 = vmatmul.msk.f32.gmra.mxu0 %vm267_vm0, %v3438_v10  ;;  %2630 = vmatmul.msk.f32.gmra.mxu1 %vm267_vm0, %v3438_v10 }
  0xb1   : > { %v3448_v11 = vpop.f32.mrf.mxu2  ;;  %v3450_v13 = vpop.f32.mrf.mxu3 }
  0xb4   : > { %v3455_v15 = vpop.f32.mrf.mxu0  ;;  %v3457_v22 = vpop.f32.mrf.mxu1 }
  0xb6   : > { %2579 = vmatmul.msk.f32.gmra.mxu2 %vm267_vm0, %v3453_v14  ;;  %2595 = vmatmul.msk.f32.gmra.mxu3 %vm267_vm0, %v3453_v14 }
  0xb7   : > { %2615 = vmatmul.msk.f32.gmra.mxu0 %vm267_vm0, %v3460_v23  ;;  %2631 = vmatmul.msk.f32.gmra.mxu1 %vm267_vm0, %v3460_v23  ;;  %v3509_v23 = vld [vmem:[%s3126_s24 + $0xa8] sm:$0xff] }
  0xb9   : > { %v3476_v32 = vpop.f32.mrf.mxu2  ;;  %v3478_v33 = vpop.f32.mrf.mxu3 }
  0xbc   : > { %v3483_v35 = vpop.f32.mrf.mxu0  ;;  %v3485_v42 = vpop.f32.mrf.mxu1 }
  0xbe   : > { %2580 = vmatmul.msk.f32.gmra.mxu2 %vm267_vm0, %v3481_v34  ;;  %2596 = vmatmul.msk.f32.gmra.mxu3 %vm267_vm0, %v3481_v34 }
  0xbf   : > { %2616 = vmatmul.msk.f32.gmra.mxu0 %vm267_vm0, %v3488_v43  ;;  %2632 = vmatmul.msk.f32.gmra.mxu1 %vm267_vm0, %v3488_v43  ;;  %v3531_v43 = vld [vmem:[%s3126_s24 + $0xb0] sm:$0xff] }
  0xc1   : > { %v3504_v26 = vpop.f32.mrf.mxu2  ;;  %v3506_v27 = vpop.f32.mrf.mxu3 }
  0xc2   : > { %4457 = vst [vmem:[#allocation14_spill] sm:$0xff] %v3504_v26 }
  0xc3   : > { %4458 = vst [vmem:[#allocation15_spill] sm:$0xff] %v3506_v27 }
  0xc4   : > { %v3511_v10 = vpop.f32.mrf.mxu0  ;;  %v3513_v3 = vpop.f32.mrf.mxu1 }
  0xc6   : > { %2581 = vmatmul.msk.f32.gmra.mxu2 %vm267_vm0, %v3509_v23  ;;  %2597 = vmatmul.msk.f32.gmra.mxu3 %vm267_vm0, %v3509_v23 }
  0xc7   : > { %2617 = vmatmul.msk.f32.gmra.mxu0 %vm267_vm0, %v3516_v61  ;;  %2633 = vmatmul.msk.f32.gmra.mxu1 %vm267_vm0, %v3516_v61 }
  0xc9   : > { %v3526_v46 = vpop.f32.mrf.mxu2  ;;  %v3528_v47 = vpop.f32.mrf.mxu3 }
  0xca   : > { %4460 = vst [vmem:[#allocation17_spill] sm:$0xff] %v3526_v46 }
  0xcb   : > { %4461 = vst [vmem:[#allocation18_spill] sm:$0xff] %v3528_v47 }
  0xcc   : > { %v3533_v55 = vpop.f32.mrf.mxu0  ;;  %v3535_v51 = vpop.f32.mrf.mxu1 }
  0xce   : > { %2582 = vmatmul.msk.f32.gmra.mxu2 %vm267_vm0, %v3531_v43  ;;  %2598 = vmatmul.msk.f32.gmra.mxu3 %vm267_vm0, %v3531_v43 }
  0xcf   : > { %2618 = vmatmul.msk.f32.gmra.mxu0 %vm267_vm0, %v3538_v49  ;;  %2634 = vmatmul.msk.f32.gmra.mxu1 %vm267_vm0, %v3538_v49 }
  0xd1   : > { %v3548_v61 = vpop.f32.mrf.mxu2  ;;  %v3550_v45 = vpop.f32.mrf.mxu3 }
  0xd2   : > { %4463 = vst [vmem:[#allocation20_spill] sm:$0xff] %v3548_v61 }
  0xd3   : > { %4464 = vst [vmem:[#allocation21_spill] sm:$0xff] %v3550_v45 }
  0xd4   : > { %v710_v41 = vpop.f32.mrf.mxu0  ;;  %v775_v39 = vpop.f32.mrf.mxu1 }
  0xd6   : > { %2657 = vmatmul.msk.f32.vlgmr.msra.gmra.mxu2 %vm267_vm0, %v3269_v36  ;;  %2673 = vmatmul.msk.f32.vlgmr.msra.gmra.mxu3 %vm267_vm0, %v3269_v36 }
  0xd7   : > { %2709 = vmatmul.msk.f32.vlgmr.msra.gmra.mxu0 %vm267_vm0, %v3164_v17  ;;  %2725 = vmatmul.msk.f32.vlgmr.msra.gmra.mxu1 %vm267_vm0, %v3164_v17 }
  0xd9   : > { %v511_v37 = vpop.f32.mrf.mxu2  ;;  %v576_v49 = vpop.f32.mrf.mxu3 }
  0xda   : > { %v512_v61 = vadd.f32 %v511_v37, %v3367_v53  ;;  %v577_v45 = vadd.f32 %v576_v49, %v3369_v54 }
  0xdc   : > { %v3562_v47 = vadd.f32 %v710_v41, %v512_v61  ;;  %v3564_v46 = vadd.f32 %v775_v39, %v577_v45  ;;  %v713_v27 = vpop.f32.mrf.mxu0  ;;  %v778_v26 = vpop.f32.mrf.mxu1 }
  0xde   : > { %2658 = vmatmul.msk.f32.gmra.mxu2 %vm267_vm0, %v3283_v38  ;;  %2674 = vmatmul.msk.f32.gmra.mxu3 %vm267_vm0, %v3283_v38 }
  0xdf   : > { %2710 = vmatmul.msk.f32.gmra.mxu0 %vm267_vm0, %v3178_v19  ;;  %2726 = vmatmul.msk.f32.gmra.mxu1 %vm267_vm0, %v3178_v19 }
  0xe1   : > { %v514_v17 = vpop.f32.mrf.mxu2  ;;  %v579_v36 = vpop.f32.mrf.mxu3 }
  0xe2   : > { %v515_v37 = vadd.f32 %v514_v17, %v3389_v59  ;;  %v580_v39 = vadd.f32 %v579_v36, %v3391_v60 }
  0xe4   : > { %v3576_v41 = vadd.f32 %v713_v27, %v515_v37  ;;  %v3578_v45 = vadd.f32 %v778_v26, %v580_v39  ;;  %v716_v49 = vpop.f32.mrf.mxu0  ;;  %v781_v53 = vpop.f32.mrf.mxu1 }
  0xe6   : > { %2659 = vmatmul.msk.f32.gmra.mxu2 %vm267_vm0, %v3297_v40  ;;  %2675 = vmatmul.msk.f32.gmra.mxu3 %vm267_vm0, %v3297_v40 }
  0xe7   : > { %2711 = vmatmul.msk.f32.gmra.mxu0 %vm267_vm0, %v3192_v21  ;;  %2727 = vmatmul.msk.f32.gmra.mxu1 %vm267_vm0, %v3192_v21 }
  0xe9   : > { %v517_v19 = vpop.f32.mrf.mxu2  ;;  %v582_v38 = vpop.f32.mrf.mxu3 }
  0xea   : > { %v518_v54 = vadd.f32 %v517_v19, %v3411_v1  ;;  %v583_v59 = vadd.f32 %v582_v38, %v3413_v2 }
  0xec   : > { %v3590_v60 = vadd.f32 %v716_v49, %v518_v54  ;;  %v3592_v61 = vadd.f32 %v781_v53, %v583_v59  ;;  %v719_v26 = vpop.f32.mrf.mxu0  ;;  %v784_v27 = vpop.f32.mrf.mxu1 }
  0xee   : > { %2660 = vmatmul.msk.f32.gmra.mxu2 %vm267_vm0, %v3317_v44  ;;  %2676 = vmatmul.msk.f32.gmra.mxu3 %vm267_vm0, %v3317_v44 }
  0xef   : > { %2712 = vmatmul.msk.f32.gmra.mxu0 %vm267_vm0, %v3212_v25  ;;  %2728 = vmatmul.msk.f32.gmra.mxu1 %vm267_vm0, %v3212_v25  ;;  %v2757_v25 = vld [vmem:[%s4413_s1 + $0xa0] sm:$0xff] }
  0xf0   : > { %1404 = vmatpush.msrb.mxu2 %v2757_v25 }
  0xf1   : > { %v520_v21 = vpop.f32.mrf.mxu2  ;;  %v585_v1 = vpop.f32.mrf.mxu3 }
  0xf2   : > { %v521_v2 = vadd.f32 %v520_v21, %v3433_v7  ;;  %v586_v17 = vadd.f32 %v585_v1, %v3435_v9  ;;  %v2758_v7 = vld [vmem:[%s4413_s1 + $0xa8] sm:$0xff] }
  0xf3   : > { %1469 = vmatpush.msrb.mxu3 %v2758_v7 }
  0xf4   : > { %v3604_v36 = vadd.f32 %v719_v26, %v521_v2  ;;  %v3606_v37 = vadd.f32 %v784_v27, %v586_v17  ;;  %v722_v39 = vpop.f32.mrf.mxu0  ;;  %v787_v49 = vpop.f32.mrf.mxu1 }
  0xf6   : > { %2661 = vmatmul.msk.f32.gmra.mxu2 %vm267_vm0, %v3337_v48  ;;  %2677 = vmatmul.msk.f32.gmra.mxu3 %vm267_vm0, %v3337_v48 }
  0xf7   : > { %2713 = vmatmul.msk.f32.gmra.mxu0 %vm267_vm0, %v3232_v29  ;;  %2729 = vmatmul.msk.f32.gmra.mxu1 %vm267_vm0, %v3232_v29  ;;  %v2811_v29 = vld [vmem:[%s4413_s1 + $0xc0] sm:$0xff] }
  0xf8   : > { %1638 = vmatpush.msrb.mxu0 %v2811_v29 }
  0xf9   : > { %v523_v9 = vpop.f32.mrf.mxu2  ;;  %v588_v53 = vpop.f32.mrf.mxu3 }
  0xfa   : > { %v524_v19 = vadd.f32 %v523_v9, %v3455_v15  ;;  %v589_v38 = vadd.f32 %v588_v53, %v3457_v22  ;;  %v2812_v15 = vld [vmem:[%s4413_s1 + $0xc8] sm:$0xff] }
  0xfb   : > { %1703 = vmatpush.msrb.mxu1 %v2812_v15 }
  0xfc   : > { %v3624_v54 = vadd.f32 %v722_v39, %v524_v19  ;;  %v3626_v59 = vadd.f32 %v787_v49, %v589_v38  ;;  %v725_v26 = vpop.f32.mrf.mxu0  ;;  %v790_v27 = vpop.f32.mrf.mxu1 }
  0xfe   : > { %2662 = vmatmul.msk.f32.gmra.mxu2 %vm267_vm0, %v3351_v50  ;;  %2678 = vmatmul.msk.f32.gmra.mxu3 %vm267_vm0, %v3351_v50 }
  0xff   : > { %2714 = vmatmul.msk.f32.gmra.mxu0 %vm267_vm0, %v3246_v31  ;;  %2730 = vmatmul.msk.f32.gmra.mxu1 %vm267_vm0, %v3246_v31 }
 0x101   : > { %v526_v22 = vpop.f32.mrf.mxu2  ;;  %v591_v21 = vpop.f32.mrf.mxu3 }
 0x102   : > { %v527_v1 = vadd.f32 %v526_v22, %v3483_v35  ;;  %v592_v2 = vadd.f32 %v591_v21, %v3485_v42 }
 0x104   : > { %v3644_v17 = vadd.f32 %v725_v26, %v527_v1  ;;  %v3646_v39 = vadd.f32 %v790_v27, %v592_v2  ;;  %v728_v49 = vpop.f32.mrf.mxu0  ;;  %v793_v25 = vpop.f32.mrf.mxu1 }
 0x106   : > { %2663 = vmatmul.msk.f32.gmra.mxu2 %vm267_vm0, %v3365_v52  ;;  %2679 = vmatmul.msk.f32.gmra.mxu3 %vm267_vm0, %v3365_v52 }
 0x107   : > { %2715 = vmatmul.msk.f32.gmra.mxu0 %vm267_vm0, %v3129_v8  ;;  %2731 = vmatmul.msk.f32.gmra.mxu1 %vm267_vm0, %v3129_v8 }
 0x109   : > { %v529_v31 = vpop.f32.mrf.mxu2  ;;  %v594_v35 = vpop.f32.mrf.mxu3 }
 0x10a   : > { %v530_v42 = vadd.f32 %v529_v31, %v3511_v10  ;;  %v595_v7 = vadd.f32 %v594_v35, %v3513_v3 }
 0x10c   : > { %v3658_v9 = vadd.f32 %v728_v49, %v530_v42  ;;  %v3660_v53 = vadd.f32 %v793_v25, %v595_v7  ;;  %v731_v19 = vpop.f32.mrf.mxu0  ;;  %v796_v38 = vpop.f32.mrf.mxu1 }
 0x10e   : > { %2664 = vmatmul.msk.f32.gmra.mxu2 %vm267_vm0, %v3387_v58  ;;  %2680 = vmatmul.msk.f32.gmra.mxu3 %vm267_vm0, %v3387_v58 }
 0x10f   : > { %2716 = vmatmul.msk.f32.gmra.mxu0 %vm267_vm0, %v3145_v12  ;;  %2732 = vmatmul.msk.f32.gmra.mxu1 %vm267_vm0, %v3145_v12 }
 0x111   : > { %v532_v8 = vpop.f32.mrf.mxu2  ;;  %v597_v3 = vpop.f32.mrf.mxu3 }
 0x112   : > { %v533_v10 = vadd.f32 %v532_v8, %v3533_v55  ;;  %v598_v26 = vadd.f32 %v597_v3, %v3535_v51 }
 0x114   : > { %v3672_v27 = vadd.f32 %v731_v19, %v533_v10  ;;  %v3674_v29 = vadd.f32 %v796_v38, %v598_v26  ;;  %v734_v15 = vpop.f32.mrf.mxu0  ;;  %v799_v22 = vpop.f32.mrf.mxu1 }
 0x116   : > { %2665 = vmatmul.msk.f32.gmra.mxu2 %vm267_vm0, %v3409_v0  ;;  %2681 = vmatmul.msk.f32.gmra.mxu3 %vm267_vm0, %v3409_v0 }
 0x117   : > { %2717 = vmatmul.msk.f32.gmra.mxu0 %vm267_vm0, %v3161_v16  ;;  %2733 = vmatmul.msk.f32.gmra.mxu1 %vm267_vm0, %v3161_v16 }
 0x119   : > { %v535_v12 = vpop.f32.mrf.mxu2  ;;  %v600_v51 = vpop.f32.mrf.mxu3 }
 0x11a   : > { %v536_v55 = vadd.f32 %v535_v12, %v3382_v56  ;;  %v601_v21 = vadd.f32 %v600_v51, %v3384_v57 }
 0x11c   : > { %v3686_v1 = vadd.f32 %v734_v15, %v536_v55  ;;  %v3688_v2 = vadd.f32 %v799_v22, %v601_v21  ;;  %v737_v49 = vpop.f32.mrf.mxu0  ;;  %v802_v25 = vpop.f32.mrf.mxu1 }
 0x11e   : > { %2666 = vmatmul.msk.f32.gmra.mxu2 %vm267_vm0, %v3431_v6  ;;  %2682 = vmatmul.msk.f32.gmra.mxu3 %vm267_vm0, %v3431_v6 }
 0x11f   : > { %2718 = vmatmul.msk.f32.gmra.mxu0 %vm267_vm0, %v3175_v18  ;;  %2734 = vmatmul.msk.f32.gmra.mxu1 %vm267_vm0, %v3175_v18 }
 0x121   : > { %v538_v16 = vpop.f32.mrf.mxu2  ;;  %v603_v56 = vpop.f32.mrf.mxu3 }
 0x122   : > { %v539_v57 = vadd.f32 %v538_v16, %v3404_v62  ;;  %v604_v31 = vadd.f32 %v603_v56, %v3406_v63 }
 0x124   : > { %v3700_v35 = vadd.f32 %v737_v49, %v539_v57  ;;  %v3702_v42 = vadd.f32 %v802_v25, %v604_v31  ;;  %v740_v7 = vpop.f32.mrf.mxu0  ;;  %v805_v19 = vpop.f32.mrf.mxu1 }
 0x126   : > { %2667 = vmatmul.msk.f32.gmra.mxu2 %vm267_vm0, %v3453_v14  ;;  %2683 = vmatmul.msk.f32.gmra.mxu3 %vm267_vm0, %v3453_v14 }
 0x127   : > { %2719 = vmatmul.msk.f32.gmra.mxu0 %vm267_vm0, %v3189_v20  ;;  %2735 = vmatmul.msk.f32.gmra.mxu1 %vm267_vm0, %v3189_v20 }
 0x129   : > { %v541_v18 = vpop.f32.mrf.mxu2  ;;  %v606_v62 = vpop.f32.mrf.mxu3 }
 0x12a   : > { %v542_v63 = vadd.f32 %v541_v18, %v3426_v4  ;;  %v607_v38 = vadd.f32 %v606_v62, %v3428_v5  ;;  %v4466_v62 = vld [vmem:[#allocation15_spill] sm:$0xff] }
 0x12c   : > { %v3714_v8 = vadd.f32 %v740_v7, %v542_v63  ;;  %v3716_v3 = vadd.f32 %v805_v19, %v607_v38  ;;  %v743_v10 = vpop.f32.mrf.mxu0  ;;  %v808_v26 = vpop.f32.mrf.mxu1  ;;  %v4465_v19 = vld [vmem:[#allocation14_spill] sm:$0xff] }
 0x12d   : > { %v3769_v38 = vld [vmem:[%s3126_s24 + $0xc0] sm:$0xff] }
 0x12e   : > { %2668 = vmatmul.msk.f32.gmra.mxu2 %vm267_vm0, %v3481_v34  ;;  %2684 = vmatmul.msk.f32.gmra.mxu3 %vm267_vm0, %v3481_v34 }
 0x12f   : > { %2720 = vmatmul.msk.f32.gmra.mxu0 %vm267_vm0, %v3209_v24  ;;  %2736 = vmatmul.msk.f32.gmra.mxu1 %vm267_vm0, %v3209_v24  ;;  %v2865_v24 = vld [vmem:[%s4413_s1 + $0xf0] sm:$0xff] }
 0x130   : > { %1868 = vmatpush.msra.mxu2 %v2865_v24  ;;  %v4468_v24 = vld [vmem:[#allocation18_spill] sm:$0xff] }
 0x131   : > { %v544_v20 = vpop.f32.mrf.mxu2  ;;  %v609_v4 = vpop.f32.mrf.mxu3 }
 0x132   : > { %v545_v5 = vadd.f32 %v544_v20, %v3448_v11  ;;  %v610_v15 = vadd.f32 %v609_v4, %v3450_v13  ;;  %v2866_v11 = vld [vmem:[%s4413_s1 + $0xf8] sm:$0xff] }
 0x133   : > { %1933 = vmatpush.msra.mxu3 %v2866_v11 }
 0x134   : > { %v3728_v22 = vadd.f32 %v743_v10, %v545_v5  ;;  %v3730_v12 = vadd.f32 %v808_v26, %v610_v15  ;;  %v746_v51 = vpop.f32.mrf.mxu0  ;;  %v811_v55 = vpop.f32.mrf.mxu1  ;;  %v3776_v5 = vld [vmem:[%s3126_s24 + $0xc1] sm:$0xff] }
 0x136   : > { %2669 = vmatmul.msk.f32.gmra.mxu2 %vm267_vm0, %v3509_v23  ;;  %2685 = vmatmul.msk.f32.gmra.mxu3 %vm267_vm0, %v3509_v23 }
 0x137   : > { %2721 = vmatmul.msk.f32.gmra.mxu0 %vm267_vm0, %v3229_v28  ;;  %2737 = vmatmul.msk.f32.gmra.mxu1 %vm267_vm0, %v3229_v28  ;;  %v2917_v28 = vld [vmem:[%s4413_s1 + $0x110] sm:$0xff] }
 0x138   : > { %2099 = vmatpush.msra.mxu0 %v2917_v28 }
 0x139   : > { %v547_v13 = vpop.f32.mrf.mxu2  ;;  %v612_v21 = vpop.f32.mrf.mxu3 }
 0x13a   : > { %v548_v49 = vadd.f32 %v547_v13, %v3476_v32  ;;  %v613_v25 = vadd.f32 %v612_v21, %v3478_v33  ;;  %v2918_v32 = vld [vmem:[%s4413_s1 + $0x118] sm:$0xff]  ;;  %v3789_v13 = vld [vmem:[%s3126_s24 + $0xc8] sm:$0xff] }
 0x13b   : > { %2164 = vmatpush.msra.mxu1 %v2918_v32 }
 0x13c   : > { %v3748_v16 = vadd.f32 %v746_v51, %v548_v49  ;;  %v3750_v56 = vadd.f32 %v811_v55, %v613_v25  ;;  %v749_v57 = vpop.f32.mrf.mxu0  ;;  %v814_v31 = vpop.f32.mrf.mxu1  ;;  %v4467_v51 = vld [vmem:[#allocation17_spill] sm:$0xff] }
 0x13e   : > { %2670 = vmatmul.msk.f32.gmra.mxu2 %vm267_vm0, %v3531_v43  ;;  %2686 = vmatmul.msk.f32.gmra.mxu3 %vm267_vm0, %v3531_v43 }
 0x13f   : > { %2722 = vmatmul.msk.f32.gmra.mxu0 %vm267_vm0, %v3243_v30  ;;  %2738 = vmatmul.msk.f32.gmra.mxu1 %vm267_vm0, %v3243_v30 }
 0x141   : > { %v550_v33 = vpop.f32.mrf.mxu2  ;;  %v615_v7 = vpop.f32.mrf.mxu3 }
 0x142   : > { %v551_v18 = vadd.f32 %v550_v33, %v4465_v19  ;;  %v616_v63 = vadd.f32 %v615_v7, %v4466_v62  ;;  %v4469_v33 = vld [vmem:[#allocation20_spill] sm:$0xff]  ;;  %v4470_v19 = vld [vmem:[#allocation21_spill] sm:$0xff] }
 0x144   : > { %v3771_v10 = vadd.f32 %v749_v57, %v551_v18  ;;  %v3773_v26 = vadd.f32 %v814_v31, %v616_v63  ;;  %v752_v20 = vpop.f32.mrf.mxu0  ;;  %v817_v4 = vpop.f32.mrf.mxu1  ;;  %v3796_v31 = vld [vmem:[%s3126_s24 + $0xc9] sm:$0xff] }
 0x146   : > { %2671 = vmatmul.msk.f32.gmra.mxu2 %vm267_vm0, %v3769_v38  ;;  %2687 = vmatmul.msk.f32.gmra.mxu3 %vm267_vm0, %v3769_v38 }
 0x147   : > { %2723 = vmatmul.msk.f32.gmra.mxu0 %vm267_vm0, %v3776_v5  ;;  %2739 = vmatmul.msk.f32.gmra.mxu1 %vm267_vm0, %v3776_v5 }
 0x149   : > { %v553_v30 = vpop.f32.mrf.mxu2  ;;  %v618_v15 = vpop.f32.mrf.mxu3 }
 0x14a   : > { %v554_v55 = vadd.f32 %v553_v30, %v4467_v51  ;;  %v619_v11 = vadd.f32 %v618_v15, %v4468_v24  ;;  %v4471_v30 = vld [vmem:[#allocation2_spill] sm:$0xff] }
 0x14c   : > { %v3791_v21 = vadd.f32 %v752_v20, %v554_v55  ;;  %v3793_v49 = vadd.f32 %v817_v4, %v619_v11  ;;  %v755_v25 = vpop.f32.mrf.mxu0  ;;  %v820_v57 = vpop.f32.mrf.mxu1 }
 0x14e   : > { %2672 = vmatmul.msk.f32.gmra.mxu2 %vm267_vm0, %v3789_v13  ;;  %2688 = vmatmul.msk.f32.gmra.mxu3 %vm267_vm0, %v3789_v13 }
 0x14f   : > { %2724 = vmatmul.msk.f32.gmra.mxu0 %vm267_vm0, %v3796_v31  ;;  %2740 = vmatmul.msk.f32.gmra.mxu1 %vm267_vm0, %v3796_v31 }
 0x151   : > { %v556_v28 = vpop.f32.mrf.mxu2  ;;  %v621_v32 = vpop.f32.mrf.mxu3 }
 0x152   : > { %v557_v7 = vadd.f32 %v556_v28, %v4469_v33  ;;  %v622_v18 = vadd.f32 %v621_v32, %v4470_v19  ;;  %v4472_v32 = vld [vmem:[#allocation3_spill] sm:$0xff] }
 0x154   : > { %v3808_v62 = vadd.f32 %v755_v25, %v557_v7  ;;  %v3810_v63 = vadd.f32 %v820_v57, %v622_v18  ;;  %v1175_v20 = vpop.f32.mrf.mxu0  ;;  %v1240_v4 = vpop.f32.mrf.mxu1 }
 0x156   : > { %2761 = vmatmul.msk.f32.vlgmr.msrb.gmra.mxu2 %vm267_vm0, %v4471_v30  ;;  %2777 = vmatmul.msk.f32.vlgmr.msrb.gmra.mxu3 %vm267_vm0, %v4471_v30 }
 0x157   : > { %2815 = vmatmul.msk.f32.vlgmr.msrb.gmra.mxu0 %vm267_vm0, %v3297_v40  ;;  %2831 = vmatmul.msk.f32.vlgmr.msrb.gmra.mxu1 %vm267_vm0, %v3297_v40 }
 0x159   : > { %v944_v15 = vpop.f32.mrf.mxu2  ;;  %v1009_v51 = vpop.f32.mrf.mxu3 }
 0x15a   : > { %v1057_v55 = vadd.f32 %v944_v15, %v3562_v47  ;;  %v1058_v24 = vadd.f32 %v1009_v51, %v3564_v46 }
 0x15c   : > { %v3822_v11 = vadd.f32 %v1175_v20, %v1057_v55  ;;  %v3824_v25 = vadd.f32 %v1240_v4, %v1058_v24  ;;  %v1178_v57 = vpop.f32.mrf.mxu0  ;;  %v1243_v28 = vpop.f32.mrf.mxu1  ;;  %v4473_v4 = vld [vmem:[#allocation4_spill] sm:$0xff] }
 0x15e   : > { %2762 = vmatmul.msk.f32.gmra.mxu2 %vm267_vm0, %v4472_v32  ;;  %2778 = vmatmul.msk.f32.gmra.mxu3 %vm267_vm0, %v4472_v32 }
 0x15f   : > { %2816 = vmatmul.msk.f32.gmra.mxu0 %vm267_vm0, %v3317_v44  ;;  %2832 = vmatmul.msk.f32.gmra.mxu1 %vm267_vm0, %v3317_v44 }
 0x161   : > { %v947_v40 = vpop.f32.mrf.mxu2  ;;  %v1012_v46 = vpop.f32.mrf.mxu3 }
 0x162   : > { %v1059_v47 = vadd.f32 %v947_v40, %v3576_v41  ;;  %v1060_v33 = vadd.f32 %v1012_v46, %v3578_v45 }
 0x164   : > { %v3836_v7 = vadd.f32 %v1178_v57, %v1059_v47  ;;  %v3838_v19 = vadd.f32 %v1243_v28, %v1060_v33  ;;  %v1181_v18 = vpop.f32.mrf.mxu0  ;;  %v1246_v20 = vpop.f32.mrf.mxu1  ;;  %v4474_v57 = vld [vmem:[#allocation5_spill] sm:$0xff]  ;;  %v4475_v33 = vld [vmem:[#allocation6_spill] sm:$0xff] }
 0x166   : > { %2763 = vmatmul.msk.f32.gmra.mxu2 %vm267_vm0, %v4473_v4  ;;  %2779 = vmatmul.msk.f32.gmra.mxu3 %vm267_vm0, %v4473_v4 }
 0x167   : > { %2817 = vmatmul.msk.f32.gmra.mxu0 %vm267_vm0, %v3337_v48  ;;  %2833 = vmatmul.msk.f32.gmra.mxu1 %vm267_vm0, %v3337_v48 }
 0x169   : > { %v950_v44 = vpop.f32.mrf.mxu2  ;;  %v1015_v41 = vpop.f32.mrf.mxu3 }
 0x16a   : > { %v1061_v45 = vadd.f32 %v950_v44, %v3590_v60  ;;  %v1062_v30 = vadd.f32 %v1015_v41, %v3592_v61 }
 0x16c   : > { %v3850_v15 = vadd.f32 %v1181_v18, %v1061_v45  ;;  %v3852_v51 = vadd.f32 %v1246_v20, %v1062_v30  ;;  %v1184_v55 = vpop.f32.mrf.mxu0  ;;  %v1249_v24 = vpop.f32.mrf.mxu1 }
 0x16e   : > { %2764 = vmatmul.msk.f32.gmra.mxu2 %vm267_vm0, %v4474_v57  ;;  %2780 = vmatmul.msk.f32.gmra.mxu3 %vm267_vm0, %v4474_v57 }
 0x16f   : > { %2818 = vmatmul.msk.f32.gmra.mxu0 %vm267_vm0, %v3351_v50  ;;  %2834 = vmatmul.msk.f32.gmra.mxu1 %vm267_vm0, %v3351_v50  ;;  %v2863_v50 = vld [vmem:[%s4413_s1 + $0xe0] sm:$0xff] }
 0x170   : > { %1869 = vmatpush.msra.mxu2 %v2863_v50 }
 0x171   : > { %v953_v48 = vpop.f32.mrf.mxu2  ;;  %v1018_v60 = vpop.f32.mrf.mxu3 }
 0x172   : > { %v1063_v61 = vadd.f32 %v953_v48, %v3604_v36  ;;  %v1064_v28 = vadd.f32 %v1018_v60, %v3606_v37  ;;  %v2864_v36 = vld [vmem:[%s4413_s1 + $0xe8] sm:$0xff] }
 0x173   : > { %1934 = vmatpush.msra.mxu3 %v2864_v36 }
 0x174   : > { %v3864_v32 = vadd.f32 %v1184_v55, %v1063_v61  ;;  %v3866_v40 = vadd.f32 %v1249_v24, %v1064_v28  ;;  %v1187_v46 = vpop.f32.mrf.mxu0  ;;  %v1252_v47 = vpop.f32.mrf.mxu1  ;;  %v4476_v55 = vld [vmem:[#allocation7_spill] sm:$0xff] }
 0x176   : > { %2765 = vmatmul.msk.f32.gmra.mxu2 %vm267_vm0, %v4475_v33  ;;  %2781 = vmatmul.msk.f32.gmra.mxu3 %vm267_vm0, %v4475_v33 }
 0x177   : > { %2819 = vmatmul.msk.f32.gmra.mxu0 %vm267_vm0, %v3365_v52  ;;  %2835 = vmatmul.msk.f32.gmra.mxu1 %vm267_vm0, %v3365_v52  ;;  %v2915_v52 = vld [vmem:[%s4413_s1 + $0x100] sm:$0xff] }
 0x178   : > { %2100 = vmatpush.msra.mxu0 %v2915_v52 }
 0x179   : > { %v956_v37 = vpop.f32.mrf.mxu2  ;;  %v1021_v18 = vpop.f32.mrf.mxu3 }
 0x17a   : > { %v1065_v20 = vadd.f32 %v956_v37, %v3624_v54  ;;  %v1066_v4 = vadd.f32 %v1021_v18, %v3626_v59  ;;  %v2916_v54 = vld [vmem:[%s4413_s1 + $0x108] sm:$0xff] }
 0x17b   : > { %2165 = vmatpush.msra.mxu1 %v2916_v54  ;;  %v4479_v54 = vld [vmem:[#allocation10_spill] sm:$0xff] }
 0x17c   : > { %v3884_v44 = vadd.f32 %v1187_v46, %v1065_v20  ;;  %v3886_v41 = vadd.f32 %v1252_v47, %v1066_v4  ;;  %v1190_v45 = vpop.f32.mrf.mxu0  ;;  %v1255_v30 = vpop.f32.mrf.mxu1  ;;  %v4477_v47 = vld [vmem:[#allocation8_spill] sm:$0xff]  ;;  %v4478_v20 = vld [vmem:[#allocation9_spill] sm:$0xff] }
 0x17e   : > { %2766 = vmatmul.msk.f32.gmra.mxu2 %vm267_vm0, %v4476_v55  ;;  %2782 = vmatmul.msk.f32.gmra.mxu3 %vm267_vm0, %v4476_v55 }
 0x17f   : > { %2820 = vmatmul.msk.f32.gmra.mxu0 %vm267_vm0, %v3387_v58  ;;  %2836 = vmatmul.msk.f32.gmra.mxu1 %vm267_vm0, %v3387_v58 }
 0x181   : > { %v959_v59 = vpop.f32.mrf.mxu2  ;;  %v1024_v24 = vpop.f32.mrf.mxu3 }
 0x182   : > { %v1067_v57 = vadd.f32 %v959_v59, %v3644_v17  ;;  %v1068_v48 = vadd.f32 %v1024_v24, %v3646_v39 }
 0x184   : > { %v3904_v60 = vadd.f32 %v1190_v45, %v1067_v57  ;;  %v3906_v61 = vadd.f32 %v1255_v30, %v1068_v48  ;;  %v1193_v28 = vpop.f32.mrf.mxu0  ;;  %v1258_v46 = vpop.f32.mrf.mxu1 }
 0x186   : > { %2767 = vmatmul.msk.f32.gmra.mxu2 %vm267_vm0, %v4477_v47  ;;  %2783 = vmatmul.msk.f32.gmra.mxu3 %vm267_vm0, %v4477_v47 }
 0x187   : > { %2821 = vmatmul.msk.f32.gmra.mxu0 %vm267_vm0, %v3409_v0  ;;  %2837 = vmatmul.msk.f32.gmra.mxu1 %vm267_vm0, %v3409_v0 }
 0x189   : > { %v962_v58 = vpop.f32.mrf.mxu2  ;;  %v1027_v17 = vpop.f32.mrf.mxu3 }
 0x18a   : > { %v1069_v39 = vadd.f32 %v962_v58, %v3658_v9  ;;  %v1070_v33 = vadd.f32 %v1027_v17, %v3660_v53 }
 0x18c   : > { %v3918_v50 = vadd.f32 %v1193_v28, %v1069_v39  ;;  %v3920_v36 = vadd.f32 %v1258_v46, %v1070_v33  ;;  %v1196_v37 = vpop.f32.mrf.mxu0  ;;  %v1261_v18 = vpop.f32.mrf.mxu1  ;;  %v4480_v46 = vld [vmem:[#allocation11_spill] sm:$0xff] }
 0x18e   : > { %2768 = vmatmul.msk.f32.gmra.mxu2 %vm267_vm0, %v4478_v20  ;;  %2784 = vmatmul.msk.f32.gmra.mxu3 %vm267_vm0, %v4478_v20 }
 0x18f   : > { %2822 = vmatmul.msk.f32.gmra.mxu0 %vm267_vm0, %v3431_v6  ;;  %2838 = vmatmul.msk.f32.gmra.mxu1 %vm267_vm0, %v3431_v6 }
 0x191   : > { %v965_v0 = vpop.f32.mrf.mxu2  ;;  %v1030_v9 = vpop.f32.mrf.mxu3 }
 0x192   : > { %v1071_v53 = vadd.f32 %v965_v0, %v3672_v27  ;;  %v1072_v4 = vadd.f32 %v1030_v9, %v3674_v29 }
 0x194   : > { %v3932_v45 = vadd.f32 %v1196_v37, %v1071_v53  ;;  %v3934_v30 = vadd.f32 %v1261_v18, %v1072_v4  ;;  %v1199_v55 = vpop.f32.mrf.mxu0  ;;  %v1264_v52 = vpop.f32.mrf.mxu1  ;;  %v4481_v37 = vld [vmem:[#allocation12_spill] sm:$0xff]  ;;  %v4482_v4 = vld [vmem:[#allocation13_spill] sm:$0xff] }
 0x196   : > { %2769 = vmatmul.msk.f32.gmra.mxu2 %vm267_vm0, %v4479_v54  ;;  %2785 = vmatmul.msk.f32.gmra.mxu3 %vm267_vm0, %v4479_v54 }
 0x197   : > { %2823 = vmatmul.msk.f32.gmra.mxu0 %vm267_vm0, %v3453_v14  ;;  %2839 = vmatmul.msk.f32.gmra.mxu1 %vm267_vm0, %v3453_v14 }
 0x199   : > { %v968_v6 = vpop.f32.mrf.mxu2  ;;  %v1033_v27 = vpop.f32.mrf.mxu3 }
 0x19a   : > { %v1073_v29 = vadd.f32 %v968_v6, %v3686_v1  ;;  %v1074_v59 = vadd.f32 %v1033_v27, %v3688_v2 }
 0x19c   : > { %v3946_v24 = vadd.f32 %v1199_v55, %v1073_v29  ;;  %v3948_v57 = vadd.f32 %v1264_v52, %v1074_v59  ;;  %v1202_v48 = vpop.f32.mrf.mxu0  ;;  %v1267_v28 = vpop.f32.mrf.mxu1  ;;  %v4483_v29 = vld [vmem:[#allocation16_spill] sm:$0xff] }
 0x19e   : > { %2770 = vmatmul.msk.f32.gmra.mxu2 %vm267_vm0, %v4480_v46  ;;  %2786 = vmatmul.msk.f32.gmra.mxu3 %vm267_vm0, %v4480_v46 }
 0x19f   : > { %2824 = vmatmul.msk.f32.gmra.mxu0 %vm267_vm0, %v3481_v34  ;;  %2840 = vmatmul.msk.f32.gmra.mxu1 %vm267_vm0, %v3481_v34 }
 0x1a1   : > { %v971_v14 = vpop.f32.mrf.mxu2  ;;  %v1036_v1 = vpop.f32.mrf.mxu3 }
 0x1a2   : > { %v1075_v2 = vadd.f32 %v971_v14, %v3700_v35  ;;  %v1076_v47 = vadd.f32 %v1036_v1, %v3702_v42  ;;  %v4484_v1 = vld [vmem:[#allocation19_spill] sm:$0xff] }
 0x1a4   : > { %v3960_v58 = vadd.f32 %v1202_v48, %v1075_v2  ;;  %v3962_v17 = vadd.f32 %v1267_v28, %v1076_v47  ;;  %v1205_v39 = vpop.f32.mrf.mxu0  ;;  %v1270_v33 = vpop.f32.mrf.mxu1  ;;  %v4017_v47 = vld [vmem:[%s3126_s24 + $0xc2] sm:$0xff] }
 0x1a6   : > { %2771 = vmatmul.msk.f32.gmra.mxu2 %vm267_vm0, %v4481_v37  ;;  %2787 = vmatmul.msk.f32.gmra.mxu3 %vm267_vm0, %v4481_v37 }
 0x1a7   : > { %2825 = vmatmul.msk.f32.gmra.mxu0 %vm267_vm0, %v3509_v23  ;;  %2841 = vmatmul.msk.f32.gmra.mxu1 %vm267_vm0, %v3509_v23 }
 0x1a9   : > { %v974_v34 = vpop.f32.mrf.mxu2  ;;  %v1039_v35 = vpop.f32.mrf.mxu3 }
 0x1aa   : > { %v1077_v42 = vadd.f32 %v974_v34, %v3714_v8  ;;  %v1078_v18 = vadd.f32 %v1039_v35, %v3716_v3  ;;  %v2809_v35 = vld [vmem:[%s3126_s24 + $0xd8] sm:$0xff] }
 0x1ac   : > { %v3974_v20 = vadd.f32 %v1205_v39, %v1077_v42  ;;  %v3976_v0 = vadd.f32 %v1270_v33, %v1078_v18  ;;  %v1208_v9 = vpop.f32.mrf.mxu0  ;;  %v1273_v53 = vpop.f32.mrf.mxu1  ;;  %v4033_v18 = vld [vmem:[%s3126_s24 + $0xca] sm:$0xff] }
 0x1ae   : > { %2772 = vmatmul.msk.f32.gmra.mxu2 %vm267_vm0, %v4482_v4  ;;  %2788 = vmatmul.msk.f32.gmra.mxu3 %vm267_vm0, %v4482_v4 }
 0x1af   : > { %2826 = vmatmul.msk.f32.gmra.mxu0 %vm267_vm0, %v3531_v43  ;;  %2842 = vmatmul.msk.f32.gmra.mxu1 %vm267_vm0, %v3531_v43 }
 0x1b1   : > { %v977_v23 = vpop.f32.mrf.mxu2  ;;  %v1042_v8 = vpop.f32.mrf.mxu3 }
 0x1b2   : > { %v1079_v3 = vadd.f32 %v977_v23, %v3728_v22  ;;  %v1080_v55 = vadd.f32 %v1042_v8, %v3730_v12  ;;  %v2810_v8 = vld [vmem:[%s3126_s24 + $0xe0] sm:$0xff] }
 0x1b4   : > { %v3988_v52 = vadd.f32 %v1208_v9, %v1079_v3  ;;  %v3990_v54 = vadd.f32 %v1273_v53, %v1080_v55  ;;  %v1211_v6 = vpop.f32.mrf.mxu0  ;;  %v1276_v27 = vpop.f32.mrf.mxu1 }
 0x1b6   : > { %2773 = vmatmul.msk.f32.gmra.mxu2 %vm267_vm0, %v4483_v29  ;;  %2789 = vmatmul.msk.f32.gmra.mxu3 %vm267_vm0, %v4483_v29 }
 0x1b7   : > { %2827 = vmatmul.msk.f32.gmra.mxu0 %vm267_vm0, %v3769_v38  ;;  %2843 = vmatmul.msk.f32.gmra.mxu1 %vm267_vm0, %v3769_v38 }
 0x1b9   : > { %v980_v43 = vpop.f32.mrf.mxu2  ;;  %v1045_v22 = vpop.f32.mrf.mxu3 }
 0x1ba   : > { %v1081_v12 = vadd.f32 %v980_v43, %v3748_v16  ;;  %v1082_v59 = vadd.f32 %v1045_v22, %v3750_v56 }
 0x1bc   : > { %v4002_v48 = vadd.f32 %v1211_v6, %v1081_v12  ;;  %v4004_v28 = vadd.f32 %v1276_v27, %v1082_v59  ;;  %v1214_v46 = vpop.f32.mrf.mxu0  ;;  %v1279_v14 = vpop.f32.mrf.mxu1  ;;  %v2847_v6 = vld [vmem:[%s3126_s24 + $0x31] sm:$0xff] }
 0x1bd   : > { %v2899_v12 = vld [vmem:[%s3126_s24 + $0x32] sm:$0xff] }
 0x1be   : > { %2774 = vmatmul.msk.f32.gmra.mxu2 %vm267_vm0, %v4484_v1  ;;  %2790 = vmatmul.msk.f32.gmra.mxu3 %vm267_vm0, %v4484_v1 }
 0x1bf   : > { %2828 = vmatmul.msk.f32.gmra.mxu0 %vm267_vm0, %v3789_v13  ;;  %2844 = vmatmul.msk.f32.gmra.mxu1 %vm267_vm0, %v3789_v13 }
 0x1c1   : > { %v983_v16 = vpop.f32.mrf.mxu2  ;;  %v1048_v56 = vpop.f32.mrf.mxu3 }
 0x1c2   : > { %v1083_v38 = vadd.f32 %v983_v16, %v3771_v10  ;;  %v1084_v2 = vadd.f32 %v1048_v56, %v3773_v26 }
 0x1c4   : > { %v4019_v39 = vadd.f32 %v1214_v46, %v1083_v38  ;;  %v4021_v33 = vadd.f32 %v1279_v14, %v1084_v2  ;;  %v1217_v37 = vpop.f32.mrf.mxu0  ;;  %v1282_v34 = vpop.f32.mrf.mxu1  ;;  %v2848_v14 = vld [vmem:[%s3126_s24 + $0x39] sm:$0xff] }
 0x1c5   : > { %v2900_v2 = vld [vmem:[%s3126_s24 + $0x3a] sm:$0xff] }
 0x1c6   : > { %2775 = vmatmul.msk.f32.gmra.mxu2 %vm267_vm0, %v4017_v47  ;;  %2791 = vmatmul.msk.f32.gmra.mxu3 %vm267_vm0, %v4017_v47 }
 0x1c7   : > { %2829 = vmatmul.msk.f32.gmra.mxu0 %vm267_vm0, %v2809_v35  ;;  %2845 = vmatmul.msk.f32.gmra.mxu1 %vm267_vm0, %v2809_v35  ;;  %v2849_v35 = vld [vmem:[%s3126_s24 + $0x49] sm:$0xff] }
 0x1c9   : > { %v986_v10 = vpop.f32.mrf.mxu2  ;;  %v1051_v26 = vpop.f32.mrf.mxu3 }
 0x1ca   : > { %v1085_v13 = vadd.f32 %v986_v10, %v3791_v21  ;;  %v1086_v42 = vadd.f32 %v1051_v26, %v3793_v49 }
 0x1cc   : > { %v4035_v9 = vadd.f32 %v1217_v37, %v1085_v13  ;;  %v4037_v53 = vadd.f32 %v1282_v34, %v1086_v42  ;;  %v1220_v4 = vpop.f32.mrf.mxu0  ;;  %v1285_v23 = vpop.f32.mrf.mxu1 }
 0x1ce   : > { %2776 = vmatmul.msk.f32.gmra.mxu2 %vm267_vm0, %v4033_v18  ;;  %2792 = vmatmul.msk.f32.gmra.mxu3 %vm267_vm0, %v4033_v18 }
 0x1cf   : > { %2830 = vmatmul.msk.f32.gmra.mxu0 %vm267_vm0, %v2810_v8  ;;  %2846 = vmatmul.msk.f32.gmra.mxu1 %vm267_vm0, %v2810_v8 }
 0x1d1   : > { %v989_v21 = vpop.f32.mrf.mxu2  ;;  %v1054_v49 = vpop.f32.mrf.mxu3 }
 0x1d2   : > { %v1087_v3 = vadd.f32 %v989_v21, %v3808_v62  ;;  %v1088_v55 = vadd.f32 %v1054_v49, %v3810_v63  ;;  %v2850_v21 = vld [vmem:[%s3126_s24 + $0x51] sm:$0xff] }
 0x1d4   : > { %v4049_v27 = vadd.f32 %v1220_v4, %v1087_v3  ;;  %v4051_v29 = vadd.f32 %v1285_v23, %v1088_v55  ;;  %v1640_v43 = vpop.f32.mrf.mxu0  ;;  %v1705_v22 = vpop.f32.mrf.mxu1  ;;  %v2901_v4 = vld [vmem:[%s3126_s24 + $0x4a] sm:$0xff] }
 0x1d6   : > { %2867 = vmatmul.msk.f32.vlgmr.msra.gmra.mxu2 %vm267_vm0, %v2847_v6  ;;  %2883 = vmatmul.msk.f32.vlgmr.msra.gmra.mxu3 %vm267_vm0, %v2847_v6 }
 0x1d7   : > { %2919 = vmatmul.msk.f32.vlgmr.msra.gmra.mxu0 %vm267_vm0, %v2899_v12  ;;  %2935 = vmatmul.msk.f32.vlgmr.msra.gmra.mxu1 %vm267_vm0, %v2899_v12 }
 0x1d9   : > { %v1406_v62 = vpop.f32.mrf.mxu2  ;;  %v1471_v59 = vpop.f32.mrf.mxu3 }
 0x1da   : > { %v1519_v63 = vadd.f32 %v1406_v62, %v3822_v11  ;;  %v1520_v46 = vadd.f32 %v1471_v59, %v3824_v25  ;;  %v2851_v62 = vld [vmem:[%s3126_s24 + $0x61] sm:$0xff] }
 0x1dc   : > { %v4061_v1 = vadd.f32 %v1640_v43, %v1519_v63  ;;  %v4063_v16 = vadd.f32 %v1705_v22, %v1520_v46  ;;  %v1643_v56 = vpop.f32.mrf.mxu0  ;;  %v1708_v38 = vpop.f32.mrf.mxu1  ;;  %v2902_v43 = vld [vmem:[%s3126_s24 + $0x52] sm:$0xff] }
 0x1de   : > { %2868 = vmatmul.msk.f32.gmra.mxu2 %vm267_vm0, %v2848_v14  ;;  %2884 = vmatmul.msk.f32.gmra.mxu3 %vm267_vm0, %v2848_v14 }
 0x1df   : > { %2920 = vmatmul.msk.f32.gmra.mxu0 %vm267_vm0, %v2900_v2  ;;  %2936 = vmatmul.msk.f32.gmra.mxu1 %vm267_vm0, %v2900_v2 }
 0x1e1   : > { %v1409_v11 = vpop.f32.mrf.mxu2  ;;  %v1474_v37 = vpop.f32.mrf.mxu3 }
 0x1e2   : > { %v1521_v25 = vadd.f32 %v1409_v11, %v3836_v7  ;;  %v1522_v34 = vadd.f32 %v1474_v37, %v3838_v19  ;;  %v2852_v11 = vld [vmem:[%s3126_s24 + $0x69] sm:$0xff] }
 0x1e4   : > { %v4073_v10 = vadd.f32 %v1643_v56, %v1521_v25  ;;  %v4075_v26 = vadd.f32 %v1708_v38, %v1522_v34  ;;  %v1646_v13 = vpop.f32.mrf.mxu0  ;;  %v1711_v42 = vpop.f32.mrf.mxu1  ;;  %v2903_v56 = vld [vmem:[%s3126_s24 + $0x62] sm:$0xff] }
 0x1e6   : > { %2869 = vmatmul.msk.f32.gmra.mxu2 %vm267_vm0, %v2849_v35  ;;  %2885 = vmatmul.msk.f32.gmra.mxu3 %vm267_vm0, %v2849_v35 }
 0x1e7   : > { %2921 = vmatmul.msk.f32.gmra.mxu0 %vm267_vm0, %v2901_v4  ;;  %2937 = vmatmul.msk.f32.gmra.mxu1 %vm267_vm0, %v2901_v4 }
 0x1e9   : > { %v1412_v7 = vpop.f32.mrf.mxu2  ;;  %v1477_v23 = vpop.f32.mrf.mxu3 }
 0x1ea   : > { %v1523_v19 = vadd.f32 %v1412_v7, %v3850_v15  ;;  %v1524_v8 = vadd.f32 %v1477_v23, %v3852_v51  ;;  %v2853_v7 = vld [vmem:[%s3126_s24 + $0x79] sm:$0xff] }
 0x1ec   : > { %v4085_v49 = vadd.f32 %v1646_v13, %v1523_v19  ;;  %v4087_v3 = vadd.f32 %v1711_v42, %v1524_v8  ;;  %v1649_v55 = vpop.f32.mrf.mxu0  ;;  %v1714_v6 = vpop.f32.mrf.mxu1  ;;  %v2904_v13 = vld [vmem:[%s3126_s24 + $0x6a] sm:$0xff] }
 0x1ee   : > { %2870 = vmatmul.msk.f32.gmra.mxu2 %vm267_vm0, %v2850_v21  ;;  %2886 = vmatmul.msk.f32.gmra.mxu3 %vm267_vm0, %v2850_v21 }
 0x1ef   : > { %2922 = vmatmul.msk.f32.gmra.mxu0 %vm267_vm0, %v2902_v43  ;;  %2938 = vmatmul.msk.f32.gmra.mxu1 %vm267_vm0, %v2902_v43 }
 0x1f1   : > { %v1415_v15 = vpop.f32.mrf.mxu2  ;;  %v1480_v22 = vpop.f32.mrf.mxu3 }
 0x1f2   : > { %v1525_v51 = vadd.f32 %v1415_v15, %v3864_v32  ;;  %v1526_v12 = vadd.f32 %v1480_v22, %v3866_v40  ;;  %v2854_v15 = vld [vmem:[%s3126_s24 + $0x81] sm:$0xff] }
 0x1f4   : > { %v4097_v59 = vadd.f32 %v1649_v55, %v1525_v51  ;;  %v4099_v63 = vadd.f32 %v1714_v6, %v1526_v12  ;;  %v1652_v46 = vpop.f32.mrf.mxu0  ;;  %v1717_v14 = vpop.f32.mrf.mxu1  ;;  %v2905_v55 = vld [vmem:[%s3126_s24 + $0x7a] sm:$0xff] }
 0x1f6   : > { %2871 = vmatmul.msk.f32.gmra.mxu2 %vm267_vm0, %v2851_v62  ;;  %2887 = vmatmul.msk.f32.gmra.mxu3 %vm267_vm0, %v2851_v62 }
 0x1f7   : > { %2923 = vmatmul.msk.f32.gmra.mxu0 %vm267_vm0, %v2903_v56  ;;  %2939 = vmatmul.msk.f32.gmra.mxu1 %vm267_vm0, %v2903_v56 }
 0x1f9   : > { %v1418_v32 = vpop.f32.mrf.mxu2  ;;  %v1483_v38 = vpop.f32.mrf.mxu3 }
 0x1fa   : > { %v1527_v40 = vadd.f32 %v1418_v32, %v3884_v44  ;;  %v1528_v2 = vadd.f32 %v1483_v38, %v3886_v41  ;;  %v2855_v32 = vld [vmem:[%s3126_s24 + $0x91] sm:$0xff] }
 0x1fc   : > { %v4109_v37 = vadd.f32 %v1652_v46, %v1527_v40  ;;  %v4111_v25 = vadd.f32 %v1717_v14, %v1528_v2  ;;  %v1655_v34 = vpop.f32.mrf.mxu0  ;;  %v1720_v35 = vpop.f32.mrf.mxu1  ;;  %v2906_v46 = vld [vmem:[%s3126_s24 + $0x82] sm:$0xff] }
 0x1fe   : > { %2872 = vmatmul.msk.f32.gmra.mxu2 %vm267_vm0, %v2852_v11  ;;  %2888 = vmatmul.msk.f32.gmra.mxu3 %vm267_vm0, %v2852_v11 }
 0x1ff   : > { %2924 = vmatmul.msk.f32.gmra.mxu0 %vm267_vm0, %v2904_v13  ;;  %2940 = vmatmul.msk.f32.gmra.mxu1 %vm267_vm0, %v2904_v13 }
 0x201   : > { %v1421_v44 = vpop.f32.mrf.mxu2  ;;  %v1486_v42 = vpop.f32.mrf.mxu3 }
 0x202   : > { %v1529_v41 = vadd.f32 %v1421_v44, %v3904_v60  ;;  %v1530_v4 = vadd.f32 %v1486_v42, %v3906_v61  ;;  %v2856_v44 = vld [vmem:[%s3126_s24 + $0x99] sm:$0xff] }
 0x204   : > { %v4121_v23 = vadd.f32 %v1655_v34, %v1529_v41  ;;  %v4123_v19 = vadd.f32 %v1720_v35, %v1530_v4  ;;  %v1658_v8 = vpop.f32.mrf.mxu0  ;;  %v1723_v21 = vpop.f32.mrf.mxu1  ;;  %v2907_v34 = vld [vmem:[%s3126_s24 + $0x92] sm:$0xff] }
 0x206   : > { %2873 = vmatmul.msk.f32.gmra.mxu2 %vm267_vm0, %v2853_v7  ;;  %2889 = vmatmul.msk.f32.gmra.mxu3 %vm267_vm0, %v2853_v7 }
 0x207   : > { %2925 = vmatmul.msk.f32.gmra.mxu0 %vm267_vm0, %v2905_v55  ;;  %2941 = vmatmul.msk.f32.gmra.mxu1 %vm267_vm0, %v2905_v55 }
 0x209   : > { %v1424_v60 = vpop.f32.mrf.mxu2  ;;  %v1489_v6 = vpop.f32.mrf.mxu3 }
 0x20a   : > { %v1531_v61 = vadd.f32 %v1424_v60, %v3918_v50  ;;  %v1532_v43 = vadd.f32 %v1489_v6, %v3920_v36  ;;  %v2857_v60 = vld [vmem:[%s3126_s24 + $0xa9] sm:$0xff] }
 0x20c   : > { %v4133_v22 = vadd.f32 %v1658_v8, %v1531_v61  ;;  %v4135_v51 = vadd.f32 %v1723_v21, %v1532_v43  ;;  %v1661_v12 = vpop.f32.mrf.mxu0  ;;  %v1726_v62 = vpop.f32.mrf.mxu1  ;;  %v2908_v8 = vld [vmem:[%s3126_s24 + $0x9a] sm:$0xff] }
 0x20e   : > { %2874 = vmatmul.msk.f32.gmra.mxu2 %vm267_vm0, %v2854_v15  ;;  %2890 = vmatmul.msk.f32.gmra.mxu3 %vm267_vm0, %v2854_v15 }
 0x20f   : > { %2926 = vmatmul.msk.f32.gmra.mxu0 %vm267_vm0, %v2906_v46  ;;  %2942 = vmatmul.msk.f32.gmra.mxu1 %vm267_vm0, %v2906_v46 }
 0x211   : > { %v1427_v50 = vpop.f32.mrf.mxu2  ;;  %v1492_v14 = vpop.f32.mrf.mxu3 }
 0x212   : > { %v1533_v36 = vadd.f32 %v1427_v50, %v3932_v45  ;;  %v1534_v56 = vadd.f32 %v1492_v14, %v3934_v30  ;;  %v2858_v50 = vld [vmem:[%s3126_s24 + $0xb1] sm:$0xff] }
 0x214   : > { %v4145_v38 = vadd.f32 %v1661_v12, %v1533_v36  ;;  %v4147_v40 = vadd.f32 %v1726_v62, %v1534_v56  ;;  %v1664_v2 = vpop.f32.mrf.mxu0  ;;  %v1729_v11 = vpop.f32.mrf.mxu1  ;;  %v2909_v12 = vld [vmem:[%s3126_s24 + $0xaa] sm:$0xff] }
 0x216   : > { %2875 = vmatmul.msk.f32.gmra.mxu2 %vm267_vm0, %v2855_v32  ;;  %2891 = vmatmul.msk.f32.gmra.mxu3 %vm267_vm0, %v2855_v32 }
 0x217   : > { %2927 = vmatmul.msk.f32.gmra.mxu0 %vm267_vm0, %v2907_v34  ;;  %2943 = vmatmul.msk.f32.gmra.mxu1 %vm267_vm0, %v2907_v34 }
 0x219   : > { %v1430_v45 = vpop.f32.mrf.mxu2  ;;  %v1495_v35 = vpop.f32.mrf.mxu3 }
 0x21a   : > { %v1535_v30 = vadd.f32 %v1430_v45, %v3946_v24  ;;  %v1536_v13 = vadd.f32 %v1495_v35, %v3948_v57 }
 0x21c   : > { %v4157_v42 = vadd.f32 %v1664_v2, %v1535_v30  ;;  %v4159_v41 = vadd.f32 %v1729_v11, %v1536_v13  ;;  %v1667_v4 = vpop.f32.mrf.mxu0  ;;  %v1732_v7 = vpop.f32.mrf.mxu1  ;;  %v2910_v2 = vld [vmem:[%s3126_s24 + $0xb2] sm:$0xff] }
 0x21e   : > { %2876 = vmatmul.msk.f32.gmra.mxu2 %vm267_vm0, %v2856_v44  ;;  %2892 = vmatmul.msk.f32.gmra.mxu3 %vm267_vm0, %v2856_v44 }
 0x21f   : > { %2928 = vmatmul.msk.f32.gmra.mxu0 %vm267_vm0, %v2908_v8  ;;  %2944 = vmatmul.msk.f32.gmra.mxu1 %vm267_vm0, %v2908_v8 }
 0x221   : > { %v1433_v24 = vpop.f32.mrf.mxu2  ;;  %v1498_v21 = vpop.f32.mrf.mxu3 }
 0x222   : > { %v1537_v57 = vadd.f32 %v1433_v24, %v3960_v58  ;;  %v1538_v55 = vadd.f32 %v1498_v21, %v3962_v17 }
 0x224   : > { %v4169_v6 = vadd.f32 %v1667_v4, %v1537_v57  ;;  %v4171_v61 = vadd.f32 %v1732_v7, %v1538_v55  ;;  %v1670_v43 = vpop.f32.mrf.mxu0  ;;  %v1735_v15 = vpop.f32.mrf.mxu1  ;;  %v2861_v57 = vld [vmem:[%s3126_s24 + $0xd9] sm:$0xff] }
 0x226   : > { %2877 = vmatmul.msk.f32.gmra.mxu2 %vm267_vm0, %v2857_v60  ;;  %2893 = vmatmul.msk.f32.gmra.mxu3 %vm267_vm0, %v2857_v60 }
 0x227   : > { %2929 = vmatmul.msk.f32.gmra.mxu0 %vm267_vm0, %v2909_v12  ;;  %2945 = vmatmul.msk.f32.gmra.mxu1 %vm267_vm0, %v2909_v12 }
 0x229   : > { %v1436_v58 = vpop.f32.mrf.mxu2  ;;  %v1501_v62 = vpop.f32.mrf.mxu3 }
 0x22a   : > { %v1539_v17 = vadd.f32 %v1436_v58, %v3974_v20  ;;  %v1540_v46 = vadd.f32 %v1501_v62, %v3976_v0  ;;  %v2862_v58 = vld [vmem:[%s3126_s24 + $0xe1] sm:$0xff] }
 0x22c   : > { %v4181_v14 = vadd.f32 %v1670_v43, %v1539_v17  ;;  %v4183_v36 = vadd.f32 %v1735_v15, %v1540_v46  ;;  %v1673_v56 = vpop.f32.mrf.mxu0  ;;  %v1738_v32 = vpop.f32.mrf.mxu1  ;;  %v2913_v15 = vld [vmem:[%s3126_s24 + $0xda] sm:$0xff] }
 0x22e   : > { %2878 = vmatmul.msk.f32.gmra.mxu2 %vm267_vm0, %v2858_v50  ;;  %2894 = vmatmul.msk.f32.gmra.mxu3 %vm267_vm0, %v2858_v50 }
 0x22f   : > { %2930 = vmatmul.msk.f32.gmra.mxu0 %vm267_vm0, %v2910_v2  ;;  %2946 = vmatmul.msk.f32.gmra.mxu1 %vm267_vm0, %v2910_v2 }
 0x231   : > { %v1439_v11 = vpop.f32.mrf.mxu2  ;;  %v1504_v20 = vpop.f32.mrf.mxu3 }
 0x232   : > { %v1541_v0 = vadd.f32 %v1439_v11, %v3988_v52  ;;  %v1542_v34 = vadd.f32 %v1504_v20, %v3990_v54 }
 0x234   : > { %v4192_v45 = vadd.f32 %v1673_v56, %v1541_v0  ;;  %v4194_v35 = vadd.f32 %v1738_v32, %v1542_v34  ;;  %v1676_v30 = vpop.f32.mrf.mxu0  ;;  %v1741_v13 = vpop.f32.mrf.mxu1  ;;  %v2914_v56 = vld [vmem:[%s3126_s24 + $0xe2] sm:$0xff]  ;;  %s2527_s24 = sshll.u32 %s4496_s16, 6 }
 0x235   : > { %s219_s6 = sadd.s32 %s2527_s24, %s2526_s15 }
 0x236   : > { %2879 = vmatmul.msk.f32.gmra.mxu2 %vm267_vm0, %v3776_v5  ;;  %2895 = vmatmul.msk.f32.gmra.mxu3 %vm267_vm0, %v3776_v5  ;;  %s2528_s16 = sshll.u32 %s219_s6, 3 }
 0x237   : > { %2931 = vmatmul.msk.f32.gmra.mxu0 %vm267_vm0, %v4017_v47  ;;  %2947 = vmatmul.msk.f32.gmra.mxu1 %vm267_vm0, %v4017_v47  ;;  %s4271_s9 = scalar_lea.vmem %s4416_s4, %s2528_s16 }
 0x239   : > { %v1442_v52 = vpop.f32.mrf.mxu2  ;;  %v1507_v54 = vpop.f32.mrf.mxu3 }
 0x23a   : > { %v1543_v44 = vadd.f32 %v1442_v52, %v4002_v48  ;;  %v1544_v4 = vadd.f32 %v1507_v54, %v4004_v28 }
 0x23c   : > { %v4206_v7 = vadd.f32 %v1676_v30, %v1543_v44  ;;  %v4208_v8 = vadd.f32 %v1741_v13, %v1544_v4  ;;  %v1679_v24 = vpop.f32.mrf.mxu0  ;;  %v1744_v5 = vpop.f32.mrf.mxu1  ;;  %v2247_v30 = vld [vmem:[%s4414_s2] sm:$0x3] }
 0x23d   : > { %v4258_v44 = vperm.slane %v2247_v30, 0  ;;  %v4260_v4 = vperm.slane %v2247_v30, 1 }
 0x23e   : > { %2880 = vmatmul.msk.f32.gmra.mxu2 %vm267_vm0, %v3796_v31  ;;  %2896 = vmatmul.msk.f32.gmra.mxu3 %vm267_vm0, %v3796_v31 }
 0x23f   : > { %2932 = vmatmul.msk.f32.gmra.mxu0 %vm267_vm0, %v4033_v18  ;;  %2948 = vmatmul.msk.f32.gmra.mxu1 %vm267_vm0, %v4033_v18 }
 0x241   : > { %v1445_v48 = vpop.f32.mrf.mxu2  ;;  %v1510_v28 = vpop.f32.mrf.mxu3 }
 0x242   : > { %v1545_v47 = vadd.f32 %v1445_v48, %v4019_v39  ;;  %v1546_v21 = vadd.f32 %v1510_v28, %v4021_v33 }
 0x244   : > { %v4221_v55 = vadd.f32 %v1679_v24, %v1545_v47  ;;  %v4223_v60 = vadd.f32 %v1744_v5, %v1546_v21  ;;  %v1682_v43 = vpop.f32.mrf.mxu0  ;;  %v1747_v31 = vpop.f32.mrf.mxu1 }
 0x246   : > { %2881 = vmatmul.msk.f32.gmra.mxu2 %vm267_vm0, %v2861_v57  ;;  %2897 = vmatmul.msk.f32.gmra.mxu3 %vm267_vm0, %v2861_v57 }
 0x247   : > { %2933 = vmatmul.msk.f32.gmra.mxu0 %vm267_vm0, %v2913_v15  ;;  %2949 = vmatmul.msk.f32.gmra.mxu1 %vm267_vm0, %v2913_v15 }
 0x249   : > { %v1448_v39 = vpop.f32.mrf.mxu2  ;;  %v1513_v33 = vpop.f32.mrf.mxu3 }
 0x24a   : > { %v1547_v18 = vadd.f32 %v1448_v39, %v4035_v9  ;;  %v1548_v12 = vadd.f32 %v1513_v33, %v4037_v53 }
 0x24c   : > { %v4233_v62 = vadd.f32 %v1682_v43, %v1547_v18  ;;  %v4235_v17 = vadd.f32 %v1747_v31, %v1548_v12  ;;  %v1685_v46 = vpop.f32.mrf.mxu0  ;;  %v1750_v50 = vpop.f32.mrf.mxu1 }
 0x24e   : > { %2882 = vmatmul.msk.f32.gmra.mxu2 %vm267_vm0, %v2862_v58  ;;  %2898 = vmatmul.msk.f32.gmra.mxu3 %vm267_vm0, %v2862_v58 }
 0x24f   : > { %2934 = vmatmul.msk.f32.gmra.mxu0 %vm267_vm0, %v2914_v56  ;;  %2950 = vmatmul.msk.f32.gmra.mxu1 %vm267_vm0, %v2914_v56 }
 0x251   : > { %v1451_v9 = vpop.f32.mrf.mxu2  ;;  %v1516_v53 = vpop.f32.mrf.mxu3 }
 0x252   : > { %v1549_v32 = vadd.f32 %v1451_v9, %v4049_v27  ;;  %v1550_v2 = vadd.f32 %v1516_v53, %v4051_v29  ;;  %v2317_v27 = vld [vmem:[%s4415_s3] sm:$0x3] }
 0x253   : > { %v4262_v5 = vperm.slane %v2317_v27, 0  ;;  %v4264_v28 = vperm.slane %v2317_v27, 1 }
 0x254   : > { %v4245_v11 = vadd.f32 %v1685_v46, %v1549_v32  ;;  %v4247_v20 = vadd.f32 %v1750_v50, %v1550_v2  ;;  %v2102_v0 = vpop.f32.mrf.mxu0  ;;  %v2167_v34 = vpop.f32.mrf.mxu1 }
 0x259   : > { %v1871_v13 = vpop.f32.mrf.mxu2  ;;  %v1936_v52 = vpop.f32.mrf.mxu3 }
 0x25a   : > { %v1984_v29 = vadd.f32 %v1871_v13, %v4061_v1  ;;  %v1985_v54 = vadd.f32 %v1936_v52, %v4063_v16 }
 0x25c   : > { %v2215_v24 = vadd.f32 %v2102_v0, %v1984_v29  ;;  %v2216_v48 = vadd.f32 %v2167_v34, %v1985_v54  ;;  %v2105_v47 = vpop.f32.mrf.mxu0  ;;  %v2170_v21 = vpop.f32.mrf.mxu1 }
 0x25e   : > { %v2253_v57 = vadd.f32 %v4258_v44, %v2215_v24  ;;  %v2254_v1 = vadd.f32 %v4260_v4, %v2216_v48 }
 0x260   : > { %vm2285_vm1 = vcmp.ge.f32.partialorder %v2253_v57, 0.0  ;;  %v2323_v16 = vmul.f32 %v4262_v5, %v2253_v57  ;;  %vm2286_vm2 = vcmp.ge.f32.partialorder %v2254_v1, 0.0  ;;  %v2324_v43 = vmul.f32 %v4264_v28, %v2254_v1 }
 0x261   : > { %v1874_v31 = vpop.f32.mrf.mxu2  ;;  %v1939_v15 = vpop.f32.mrf.mxu3 }
 0x262   : > { %v2355_v39 = vsel %vm2285_vm1, %v2253_v57, %v2323_v16  ;;  %v2356_v33 = vsel %vm2286_vm2, %v2254_v1, %v2324_v43  ;;  %v1986_v18 = vadd.f32 %v1874_v31, %v4073_v10  ;;  %v1987_v12 = vadd.f32 %v1939_v15, %v4075_v26 }
 0x263   : > { %2387 = vst [vmem:[%s4271_s9] sm:$0xff] %v2355_v39 }
 0x264   : > { %2388 = vst [vmem:[%s4271_s9 + $0x8] sm:$0xff] %v2356_v33  ;;  %v2217_v58 = vadd.f32 %v2105_v47, %v1986_v18  ;;  %v2218_v46 = vadd.f32 %v2170_v21, %v1987_v12  ;;  %v2108_v50 = vpop.f32.mrf.mxu0  ;;  %v2173_v56 = vpop.f32.mrf.mxu1 }
 0x266   : > { %v2255_v9 = vadd.f32 %v4258_v44, %v2217_v58  ;;  %v2256_v53 = vadd.f32 %v4260_v4, %v2218_v46 }
 0x268   : > { %vm2287_vm3 = vcmp.ge.f32.partialorder %v2255_v9, 0.0  ;;  %v2325_v32 = vmul.f32 %v4262_v5, %v2255_v9  ;;  %vm2288_vm4 = vcmp.ge.f32.partialorder %v2256_v53, 0.0  ;;  %v2326_v10 = vmul.f32 %v4264_v28, %v2256_v53 }
 0x269   : > { %v1877_v2 = vpop.f32.mrf.mxu2  ;;  %v1942_v26 = vpop.f32.mrf.mxu3 }
 0x26a   : > { %v2357_v0 = vsel %vm2287_vm3, %v2255_v9, %v2325_v32  ;;  %v2358_v34 = vsel %vm2288_vm4, %v2256_v53, %v2326_v10  ;;  %v1988_v30 = vadd.f32 %v1877_v2, %v4085_v49  ;;  %v1989_v13 = vadd.f32 %v1942_v26, %v4087_v3 }
 0x26b   : > { %2389 = vst [vmem:[%s4271_s9 + $0x10] sm:$0xff] %v2357_v0 }
 0x26c   : > { %2390 = vst [vmem:[%s4271_s9 + $0x18] sm:$0xff] %v2358_v34  ;;  %v2219_v52 = vadd.f32 %v2108_v50, %v1988_v30  ;;  %v2220_v27 = vadd.f32 %v2173_v56, %v1989_v13  ;;  %v2111_v29 = vpop.f32.mrf.mxu0  ;;  %v2176_v54 = vpop.f32.mrf.mxu1 }
 0x26e   : > { %v2257_v24 = vadd.f32 %v4258_v44, %v2219_v52  ;;  %v2258_v48 = vadd.f32 %v4260_v4, %v2220_v27 }
 0x270   : > { %vm2289_vm5 = vcmp.ge.f32.partialorder %v2257_v24, 0.0  ;;  %v2327_v47 = vmul.f32 %v4262_v5, %v2257_v24  ;;  %vm2290_vm6 = vcmp.ge.f32.partialorder %v2258_v48, 0.0  ;;  %v2328_v49 = vmul.f32 %v4264_v28, %v2258_v48 }
 0x271   : > { %v1880_v21 = vpop.f32.mrf.mxu2  ;;  %v1945_v3 = vpop.f32.mrf.mxu3 }
 0x272   : > { %v2359_v57 = vsel %vm2289_vm5, %v2257_v24, %v2327_v47  ;;  %v2360_v1 = vsel %vm2290_vm6, %v2258_v48, %v2328_v49  ;;  %v1990_v16 = vadd.f32 %v1880_v21, %v4097_v59  ;;  %v1991_v43 = vadd.f32 %v1945_v3, %v4099_v63 }
 0x273   : > { %2391 = vst [vmem:[%s4271_s9 + $0x20] sm:$0xff] %v2359_v57 }
 0x274   : > { %2392 = vst [vmem:[%s4271_s9 + $0x28] sm:$0xff] %v2360_v1  ;;  %v2221_v31 = vadd.f32 %v2111_v29, %v1990_v16  ;;  %v2222_v15 = vadd.f32 %v2176_v54, %v1991_v43  ;;  %v2114_v39 = vpop.f32.mrf.mxu0  ;;  %v2179_v33 = vpop.f32.mrf.mxu1 }
 0x276   : > { %v2259_v18 = vadd.f32 %v4258_v44, %v2221_v31  ;;  %v2260_v12 = vadd.f32 %v4260_v4, %v2222_v15 }
 0x278   : > { %vm2291_vm7 = vcmp.ge.f32.partialorder %v2259_v18, 0.0  ;;  %v2329_v58 = vmul.f32 %v4262_v5, %v2259_v18  ;;  %vm2292_vm8 = vcmp.ge.f32.partialorder %v2260_v12, 0.0  ;;  %v2330_v59 = vmul.f32 %v4264_v28, %v2260_v12 }
 0x279   : > { %v1883_v46 = vpop.f32.mrf.mxu2  ;;  %v1948_v63 = vpop.f32.mrf.mxu3 }
 0x27a   : > { %v2361_v50 = vsel %vm2291_vm7, %v2259_v18, %v2329_v58  ;;  %v2362_v56 = vsel %vm2292_vm8, %v2260_v12, %v2330_v59  ;;  %v1992_v9 = vadd.f32 %v1883_v46, %v4109_v37  ;;  %v1993_v53 = vadd.f32 %v1948_v63, %v4111_v25 }
 0x27b   : > { %2393 = vst [vmem:[%s4271_s9 + $0x30] sm:$0xff] %v2361_v50 }
 0x27c   : > { %2394 = vst [vmem:[%s4271_s9 + $0x38] sm:$0xff] %v2362_v56  ;;  %v2223_v32 = vadd.f32 %v2114_v39, %v1992_v9  ;;  %v2224_v10 = vadd.f32 %v2179_v33, %v1993_v53  ;;  %v2117_v2 = vpop.f32.mrf.mxu0  ;;  %v2182_v26 = vpop.f32.mrf.mxu1 }
 0x27e   : > { %v2261_v0 = vadd.f32 %v4258_v44, %v2223_v32  ;;  %v2262_v34 = vadd.f32 %v4260_v4, %v2224_v10 }
 0x280   : > { %vm2293_vm9 = vcmp.ge.f32.partialorder %v2261_v0, 0.0  ;;  %v2331_v30 = vmul.f32 %v4262_v5, %v2261_v0  ;;  %vm2294_vm10 = vcmp.ge.f32.partialorder %v2262_v34, 0.0  ;;  %v2332_v37 = vmul.f32 %v4264_v28, %v2262_v34 }
 0x281   : > { %v1886_v13 = vpop.f32.mrf.mxu2  ;;  %v1951_v25 = vpop.f32.mrf.mxu3 }
 0x282   : > { %v2363_v52 = vsel %vm2293_vm9, %v2261_v0, %v2331_v30  ;;  %v2364_v27 = vsel %vm2294_vm10, %v2262_v34, %v2332_v37  ;;  %v1994_v29 = vadd.f32 %v1886_v13, %v4121_v23  ;;  %v1995_v54 = vadd.f32 %v1951_v25, %v4123_v19 }
 0x283   : > { %2395 = vst [vmem:[%s4271_s9 + $0x40] sm:$0xff] %v2363_v52 }
 0x284   : > { %2396 = vst [vmem:[%s4271_s9 + $0x48] sm:$0xff] %v2364_v27  ;;  %v2225_v24 = vadd.f32 %v2117_v2, %v1994_v29  ;;  %v2226_v48 = vadd.f32 %v2182_v26, %v1995_v54  ;;  %v2120_v47 = vpop.f32.mrf.mxu0  ;;  %v2185_v49 = vpop.f32.mrf.mxu1 }
 0x286   : > { %v2263_v21 = vadd.f32 %v4258_v44, %v2225_v24  ;;  %v2264_v3 = vadd.f32 %v4260_v4, %v2226_v48 }
 0x288   : > { %vm2295_vm11 = vcmp.ge.f32.partialorder %v2263_v21, 0.0  ;;  %v2333_v57 = vmul.f32 %v4262_v5, %v2263_v21  ;;  %vm2296_vm12 = vcmp.ge.f32.partialorder %v2264_v3, 0.0  ;;  %v2334_v23 = vmul.f32 %v4264_v28, %v2264_v3 }
 0x289   : > { %v1889_v1 = vpop.f32.mrf.mxu2  ;;  %v1954_v19 = vpop.f32.mrf.mxu3 }
 0x28a   : > { %v2365_v16 = vsel %vm2295_vm11, %v2263_v21, %v2333_v57  ;;  %v2366_v43 = vsel %vm2296_vm12, %v2264_v3, %v2334_v23  ;;  %v1996_v31 = vadd.f32 %v1889_v1, %v4133_v22  ;;  %v1997_v15 = vadd.f32 %v1954_v19, %v4135_v51 }
 0x28b   : > { %2397 = vst [vmem:[%s4271_s9 + $0x50] sm:$0xff] %v2365_v16 }
 0x28c   : > { %2398 = vst [vmem:[%s4271_s9 + $0x58] sm:$0xff] %v2366_v43  ;;  %v2227_v39 = vadd.f32 %v2120_v47, %v1996_v31  ;;  %v2228_v33 = vadd.f32 %v2185_v49, %v1997_v15  ;;  %v2123_v18 = vpop.f32.mrf.mxu0  ;;  %v2188_v12 = vpop.f32.mrf.mxu1 }
 0x28e   : > { %v2265_v58 = vadd.f32 %v4258_v44, %v2227_v39  ;;  %v2266_v59 = vadd.f32 %v4260_v4, %v2228_v33 }
 0x290   : > { %vm2297_vm13 = vcmp.ge.f32.partialorder %v2265_v58, 0.0  ;;  %v2335_v46 = vmul.f32 %v4262_v5, %v2265_v58  ;;  %vm2298_vm14 = vcmp.ge.f32.partialorder %v2266_v59, 0.0  ;;  %v2336_v22 = vmul.f32 %v4264_v28, %v2266_v59 }
 0x291   : > { %v1892_v63 = vpop.f32.mrf.mxu2  ;;  %v1957_v51 = vpop.f32.mrf.mxu3 }
 0x292   : > { %v2367_v50 = vsel %vm2297_vm13, %v2265_v58, %v2335_v46  ;;  %v2368_v56 = vsel %vm2298_vm14, %v2266_v59, %v2336_v22  ;;  %v1998_v9 = vadd.f32 %v1892_v63, %v4145_v38  ;;  %v1999_v53 = vadd.f32 %v1957_v51, %v4147_v40 }
 0x293   : > { %2399 = vst [vmem:[%s4271_s9 + $0x60] sm:$0xff] %v2367_v50 }
 0x294   : > { %2400 = vst [vmem:[%s4271_s9 + $0x68] sm:$0xff] %v2368_v56  ;;  %v2229_v32 = vadd.f32 %v2123_v18, %v1998_v9  ;;  %v2230_v10 = vadd.f32 %v2188_v12, %v1999_v53  ;;  %v2126_v2 = vpop.f32.mrf.mxu0  ;;  %v2191_v26 = vpop.f32.mrf.mxu1 }
 0x296   : > { %v2267_v0 = vadd.f32 %v4258_v44, %v2229_v32  ;;  %v2268_v34 = vadd.f32 %v4260_v4, %v2230_v10 }
 0x298   : > { %vm2299_vm15 = vcmp.ge.f32.partialorder %v2267_v0, 0.0  ;;  %v2337_v30 = vmul.f32 %v4262_v5, %v2267_v0  ;;  %vm2300_vm0 = vcmp.ge.f32.partialorder %v2268_v34, 0.0  ;;  %v2338_v38 = vmul.f32 %v4264_v28, %v2268_v34 }
 0x299   : > { %v1895_v37 = vpop.f32.mrf.mxu2  ;;  %v1960_v40 = vpop.f32.mrf.mxu3 }
 0x29a   : > { %v2369_v13 = vsel %vm2299_vm15, %v2267_v0, %v2337_v30  ;;  %v2370_v25 = vsel %vm2300_vm0, %v2268_v34, %v2338_v38  ;;  %v2000_v52 = vadd.f32 %v1895_v37, %v4157_v42  ;;  %v2001_v27 = vadd.f32 %v1960_v40, %v4159_v41 }
 0x29b   : > { %2401 = vst [vmem:[%s4271_s9 + $0x70] sm:$0xff] %v2369_v13 }
 0x29c   : > { %2402 = vst [vmem:[%s4271_s9 + $0x78] sm:$0xff] %v2370_v25  ;;  %v2231_v29 = vadd.f32 %v2126_v2, %v2000_v52  ;;  %v2232_v54 = vadd.f32 %v2191_v26, %v2001_v27  ;;  %v2129_v24 = vpop.f32.mrf.mxu0  ;;  %v2194_v48 = vpop.f32.mrf.mxu1 }
 0x29e   : > { %v2269_v47 = vadd.f32 %v4258_v44, %v2231_v29  ;;  %v2270_v49 = vadd.f32 %v4260_v4, %v2232_v54 }
 0x2a0   : > { %vm2301_vm1 = vcmp.ge.f32.partialorder %v2269_v47, 0.0  ;;  %v2339_v21 = vmul.f32 %v4262_v5, %v2269_v47  ;;  %vm2302_vm2 = vcmp.ge.f32.partialorder %v2270_v49, 0.0  ;;  %v2340_v42 = vmul.f32 %v4264_v28, %v2270_v49 }
 0x2a1   : > { %v1898_v3 = vpop.f32.mrf.mxu2  ;;  %v1963_v41 = vpop.f32.mrf.mxu3 }
 0x2a2   : > { %v2371_v57 = vsel %vm2301_vm1, %v2269_v47, %v2339_v21  ;;  %v2372_v23 = vsel %vm2302_vm2, %v2270_v49, %v2340_v42  ;;  %v2002_v1 = vadd.f32 %v1898_v3, %v4169_v6  ;;  %v2003_v19 = vadd.f32 %v1963_v41, %v4171_v61 }
 0x2a3   : > { %2403 = vst [vmem:[%s4271_s9 + $0x80] sm:$0xff] %v2371_v57 }
 0x2a4   : > { %2404 = vst [vmem:[%s4271_s9 + $0x88] sm:$0xff] %v2372_v23  ;;  %v2233_v16 = vadd.f32 %v2129_v24, %v2002_v1  ;;  %v2234_v43 = vadd.f32 %v2194_v48, %v2003_v19  ;;  %v2132_v31 = vpop.f32.mrf.mxu0  ;;  %v2197_v15 = vpop.f32.mrf.mxu1 }
 0x2a6   : > { %v2271_v39 = vadd.f32 %v4258_v44, %v2233_v16  ;;  %v2272_v33 = vadd.f32 %v4260_v4, %v2234_v43 }
 0x2a8   : > { %vm2303_vm3 = vcmp.ge.f32.partialorder %v2271_v39, 0.0  ;;  %v2341_v18 = vmul.f32 %v4262_v5, %v2271_v39  ;;  %vm2304_vm4 = vcmp.ge.f32.partialorder %v2272_v33, 0.0  ;;  %v2342_v6 = vmul.f32 %v4264_v28, %v2272_v33 }
 0x2a9   : > { %v1901_v12 = vpop.f32.mrf.mxu2  ;;  %v1966_v61 = vpop.f32.mrf.mxu3 }
 0x2aa   : > { %v2373_v58 = vsel %vm2303_vm3, %v2271_v39, %v2341_v18  ;;  %v2374_v59 = vsel %vm2304_vm4, %v2272_v33, %v2342_v6  ;;  %v2004_v46 = vadd.f32 %v1901_v12, %v4181_v14  ;;  %v2005_v22 = vadd.f32 %v1966_v61, %v4183_v36 }
 0x2ab   : > { %2405 = vst [vmem:[%s4271_s9 + $0x90] sm:$0xff] %v2373_v58 }
 0x2ac   : > { %2406 = vst [vmem:[%s4271_s9 + $0x98] sm:$0xff] %v2374_v59  ;;  %v2235_v63 = vadd.f32 %v2132_v31, %v2004_v46  ;;  %v2236_v51 = vadd.f32 %v2197_v15, %v2005_v22  ;;  %v2135_v50 = vpop.f32.mrf.mxu0  ;;  %v2200_v56 = vpop.f32.mrf.mxu1 }
 0x2ae   : > { %v2273_v9 = vadd.f32 %v4258_v44, %v2235_v63  ;;  %v2274_v53 = vadd.f32 %v4260_v4, %v2236_v51 }
 0x2b0   : > { %vm2305_vm5 = vcmp.ge.f32.partialorder %v2273_v9, 0.0  ;;  %v2343_v32 = vmul.f32 %v4262_v5, %v2273_v9  ;;  %vm2306_vm6 = vcmp.ge.f32.partialorder %v2274_v53, 0.0  ;;  %v2344_v14 = vmul.f32 %v4264_v28, %v2274_v53 }
 0x2b1   : > { %v1904_v10 = vpop.f32.mrf.mxu2  ;;  %v1969_v36 = vpop.f32.mrf.mxu3 }
 0x2b2   : > { %v2375_v2 = vsel %vm2305_vm5, %v2273_v9, %v2343_v32  ;;  %v2376_v26 = vsel %vm2306_vm6, %v2274_v53, %v2344_v14  ;;  %v2006_v0 = vadd.f32 %v1904_v10, %v4192_v45  ;;  %v2007_v34 = vadd.f32 %v1969_v36, %v4194_v35 }
 0x2b3   : > { %2407 = vst [vmem:[%s4271_s9 + $0xa0] sm:$0xff] %v2375_v2 }
 0x2b4   : > { %2408 = vst [vmem:[%s4271_s9 + $0xa8] sm:$0xff] %v2376_v26  ;;  %v2237_v30 = vadd.f32 %v2135_v50, %v2006_v0  ;;  %v2238_v38 = vadd.f32 %v2200_v56, %v2007_v34  ;;  %v2138_v37 = vpop.f32.mrf.mxu0  ;;  %v2203_v40 = vpop.f32.mrf.mxu1 }
 0x2b6   : > { %v2275_v13 = vadd.f32 %v4258_v44, %v2237_v30  ;;  %v2276_v25 = vadd.f32 %v4260_v4, %v2238_v38 }
 0x2b8   : > { %vm2307_vm7 = vcmp.ge.f32.partialorder %v2275_v13, 0.0  ;;  %v2345_v52 = vmul.f32 %v4262_v5, %v2275_v13  ;;  %vm2308_vm8 = vcmp.ge.f32.partialorder %v2276_v25, 0.0  ;;  %v2346_v45 = vmul.f32 %v4264_v28, %v2276_v25 }
 0x2b9   : > { %v1907_v27 = vpop.f32.mrf.mxu2  ;;  %v1972_v35 = vpop.f32.mrf.mxu3 }
 0x2ba   : > { %v2377_v29 = vsel %vm2307_vm7, %v2275_v13, %v2345_v52  ;;  %v2378_v54 = vsel %vm2308_vm8, %v2276_v25, %v2346_v45  ;;  %v2008_v24 = vadd.f32 %v1907_v27, %v4206_v7  ;;  %v2009_v48 = vadd.f32 %v1972_v35, %v4208_v8 }
 0x2bb   : > { %2409 = vst [vmem:[%s4271_s9 + $0xb0] sm:$0xff] %v2377_v29 }
 0x2bc   : > { %2410 = vst [vmem:[%s4271_s9 + $0xb8] sm:$0xff] %v2378_v54  ;;  %v2239_v47 = vadd.f32 %v2138_v37, %v2008_v24  ;;  %v2240_v49 = vadd.f32 %v2203_v40, %v2009_v48  ;;  %v2141_v21 = vpop.f32.mrf.mxu0  ;;  %v2206_v42 = vpop.f32.mrf.mxu1 }
 0x2be   : > { %v2277_v3 = vadd.f32 %v4258_v44, %v2239_v47  ;;  %v2278_v41 = vadd.f32 %v4260_v4, %v2240_v49 }
 0x2c0   : > { %vm2309_vm9 = vcmp.ge.f32.partialorder %v2277_v3, 0.0  ;;  %v2347_v57 = vmul.f32 %v4262_v5, %v2277_v3  ;;  %vm2310_vm10 = vcmp.ge.f32.partialorder %v2278_v41, 0.0  ;;  %v2348_v7 = vmul.f32 %v4264_v28, %v2278_v41 }
 0x2c1   : > { %v1910_v23 = vpop.f32.mrf.mxu2  ;;  %v1975_v8 = vpop.f32.mrf.mxu3 }
 0x2c2   : > { %v2379_v1 = vsel %vm2309_vm9, %v2277_v3, %v2347_v57  ;;  %v2380_v19 = vsel %vm2310_vm10, %v2278_v41, %v2348_v7  ;;  %v2010_v16 = vadd.f32 %v1910_v23, %v4221_v55  ;;  %v2011_v43 = vadd.f32 %v1975_v8, %v4223_v60 }
 0x2c3   : > { %2411 = vst [vmem:[%s4271_s9 + $0xc0] sm:$0xff] %v2379_v1 }
 0x2c4   : > { %2412 = vst [vmem:[%s4271_s9 + $0xc8] sm:$0xff] %v2380_v19  ;;  %v2241_v31 = vadd.f32 %v2141_v21, %v2010_v16  ;;  %v2242_v15 = vadd.f32 %v2206_v42, %v2011_v43  ;;  %v2144_v18 = vpop.f32.mrf.mxu0  ;;  %v2209_v6 = vpop.f32.mrf.mxu1 }
 0x2c6   : > { %v2279_v39 = vadd.f32 %v4258_v44, %v2241_v31  ;;  %v2280_v33 = vadd.f32 %v4260_v4, %v2242_v15 }
 0x2c8   : > { %vm2311_vm11 = vcmp.ge.f32.partialorder %v2279_v39, 0.0  ;;  %v2349_v12 = vmul.f32 %v4262_v5, %v2279_v39  ;;  %vm2312_vm12 = vcmp.ge.f32.partialorder %v2280_v33, 0.0  ;;  %v2350_v55 = vmul.f32 %v4264_v28, %v2280_v33 }
 0x2c9   : > { %v1913_v61 = vpop.f32.mrf.mxu2  ;;  %v1978_v60 = vpop.f32.mrf.mxu3 }
 0x2ca   : > { %v2381_v58 = vsel %vm2311_vm11, %v2279_v39, %v2349_v12  ;;  %v2382_v59 = vsel %vm2312_vm12, %v2280_v33, %v2350_v55  ;;  %v2012_v46 = vadd.f32 %v1913_v61, %v4233_v62  ;;  %v2013_v22 = vadd.f32 %v1978_v60, %v4235_v17 }
 0x2cb   : > { %2413 = vst [vmem:[%s4271_s9 + $0xd0] sm:$0xff] %v2381_v58 }
 0x2cc   : > { %2414 = vst [vmem:[%s4271_s9 + $0xd8] sm:$0xff] %v2382_v59  ;;  %v2243_v63 = vadd.f32 %v2144_v18, %v2012_v46  ;;  %v2244_v51 = vadd.f32 %v2209_v6, %v2013_v22  ;;  %v2147_v32 = vpop.f32.mrf.mxu0  ;;  %v2212_v62 = vpop.f32.mrf.mxu1 }
 0x2ce   : > { %v2281_v50 = vadd.f32 %v4258_v44, %v2243_v63  ;;  %v2282_v56 = vadd.f32 %v4260_v4, %v2244_v51 }
 0x2d0   : > { %vm2313_vm13 = vcmp.ge.f32.partialorder %v2281_v50, 0.0  ;;  %v2351_v9 = vmul.f32 %v4262_v5, %v2281_v50  ;;  %vm2314_vm14 = vcmp.ge.f32.partialorder %v2282_v56, 0.0  ;;  %v2352_v53 = vmul.f32 %v4264_v28, %v2282_v56 }
 0x2d1   : > { %v1916_v14 = vpop.f32.mrf.mxu2  ;;  %v1981_v17 = vpop.f32.mrf.mxu3 }
 0x2d2   : > { %v2383_v10 = vsel %vm2313_vm13, %v2281_v50, %v2351_v9  ;;  %v2384_v36 = vsel %vm2314_vm14, %v2282_v56, %v2352_v53  ;;  %v2014_v2 = vadd.f32 %v1916_v14, %v4245_v11  ;;  %v2015_v26 = vadd.f32 %v1981_v17, %v4247_v20 }
 0x2d3   : > { %2415 = vst [vmem:[%s4271_s9 + $0xe0] sm:$0xff] %v2383_v10 }
 0x2d4   : > { %2416 = vst [vmem:[%s4271_s9 + $0xe8] sm:$0xff] %v2384_v36  ;;  %v2245_v0 = vadd.f32 %v2147_v32, %v2014_v2  ;;  %v2246_v34 = vadd.f32 %v2212_v62, %v2015_v26 }
 0x2d6   : > { %v2283_v30 = vadd.f32 %v4258_v44, %v2245_v0  ;;  %v2284_v38 = vadd.f32 %v4260_v4, %v2246_v34 }
 0x2d8   : > { %vm2315_vm15 = vcmp.ge.f32.partialorder %v2283_v30, 0.0  ;;  %v2353_v37 = vmul.f32 %v4262_v5, %v2283_v30  ;;  %vm2316_vm0 = vcmp.ge.f32.partialorder %v2284_v38, 0.0  ;;  %v2354_v40 = vmul.f32 %v4264_v28, %v2284_v38 }
 0x2da   : > { %v2385_v13 = vsel %vm2315_vm15, %v2283_v30, %v2353_v37  ;;  %v2386_v25 = vsel %vm2316_vm0, %v2284_v38, %v2354_v40 }
 0x2db   : > { %2417 = vst [vmem:[%s4271_s9 + $0xf0] sm:$0xff] %v2385_v13 }
 0x2dc   : > { %2418 = vst [vmem:[%s4271_s9 + $0xf8] sm:$0xff] %v2386_v25 }
 0x2dd PF: > { %s14_s19 = sadd.s32 1, %s3036_s19   ;;  %s4485_s15 = smov %s3028_s17 }
 0x2de   : > { %p11_p7 = scmp.ge.s32.totalorder %s14_s19, 6   ;;  %s4486_s16 = smov %s3032_s18 }
 0x2df   : > { %s4487_s17 = smov %s4490_s20  ;;  %s4488_s18 = smov %s4494_s21 }
 0x2e0   :  { %13 = sbr.rel (!%p11_p7) target bundleno = 3 (0x3), region = 77 }

</bundles_post_ra>
